<compile_context>
chip_gen: v5e
topology: v5e:2x2
jax: 0.10.0
libtpu: 0.0.40
codegen_flags: <defaults>
</compile_context>

<pallas_src>
import functools

import jax
import jax.numpy as jnp
from jax.experimental import pallas as pl
from jax.experimental.pallas import tpu as pltpu


def _rgcn_kernel(
    feat_body_ref,   # (TB*N, D)       node features, rows ordered (b, i)
    feat_img1_ref,   # (TB*N*N, D)     pairwise union features, rows (b, i, j)
    feat_img2_ref,   # (TB, D)         global image feature
    feat_ssl_ref,    # (TB, D)         SSL image feature
    mask_ref,        # (TB*N*N, 1)     pairwise mask, rows (b, i, j)
    r_rep_ref,       # (TB*N*N, C*TB*N) const: pair-row -> (b, j) column, tiled C times
    qt_big_ref,      # (TB*N, TB*N*N)  const: groups pair rows by (b, i)
    expand_c_ref,    # (C, C*TB*N)     const: broadcast relation-c attention over block c
    exp_b_ref,       # (TB*N, TB)      const: per-batch row -> (b, i) rows
    pool_b_ref,      # (TB, TB*N)      const: 0/1 node->batch sum (scaled by 1/N here)
    w_edge_t_ref,    # (D, C)
    w_img_ref,       # (D, D)
    w_rel_cat_ref,   # (D, C*D)
    b_rel_cat_ref,   # (1, C*D)  f32
    w_gx_cat_ref,    # (D, 3*D)
    w_gh_cat_ref,    # (D, 3*D)
    b_g_cat_ref,     # (1, 3*D)  f32
    w_cls_ref,       # (D, NC)
    w_ssl_ref,       # (D, NC)
    b_cls_ref,       # (1, NC)   f32
    scores_ref,      # (TB, NC)  out
    adj_scr,         # (C, TB*N, TB*N) f32 VMEM scratch: per-relation adjacency
    *,
    time_step: int,
    edge_types: int,
    inv_node: float,
    use_bf16: bool,
):
    TBN, D = feat_body_ref.shape
    C = edge_types
    mm_dtype = jnp.bfloat16 if use_bf16 else jnp.float32

    def mm(a, b):
        # astype is a no-op for operands already resident in mm_dtype (weights,
        # selection constants), so no per-call cast cost for them.
        return jnp.dot(a.astype(mm_dtype), b.astype(mm_dtype),
                       preferred_element_type=jnp.float32)

    # --- edge-type attention: one lane-dense MXU matmul + softmax over C ---
    img2d = feat_img1_ref[...]                              # (TBNN, D) f32
    logits = mm(img2d, w_edge_t_ref[...])                   # (TBNN, C)
    m = jnp.max(logits, axis=-1, keepdims=True)
    e = jnp.exp(logits - m)
    denom = jnp.sum(e, axis=-1, keepdims=True)
    att = e * pl.reciprocal(denom, approx=True)             # softmax over relations
    adjm = att * mask_ref[...]                              # mask AFTER softmax (ref semantics)

    # --- per-relation block-diagonal adjacency, built with ONE lane-dense MXU
    # push (no in-kernel concatenates):
    #   att_expand[:, c*TBN:(c+1)*TBN] == adjm[:, c] broadcast  (tiny matmul)
    #   X = att_expand * r_rep                                  (VPU)
    #   adj_cat = qt_big @ X  -> (TBN, C*TBN)                   (single matmul)
    att_expand = mm(adjm, expand_c_ref[...])                # (TBNN, C*TBN) f32
    x_cat = att_expand.astype(mm_dtype) * r_rep_ref[...]    # (TBNN, C*TBN)
    adj_cat = mm(qt_big_ref[...], x_cat)                    # (TBN, C*TBN) f32
    for c in range(C):
        adj_scr[c] = adj_cat[:, c * TBN:(c + 1) * TBN]      # park in VMEM scratch

    # --- global image-context message, hoisted & broadcast once ---
    img_msg = mm(feat_img2_ref[...], w_img_ref[...])        # (TB, D)
    ximg = mm(exp_b_ref[...], img_msg)                      # (TBN, D)

    h2d = feat_body_ref[...]                                # (TBN, D) f32 node states

    # --- gated message passing for `time_step` rounds ---
    for _ in range(time_step):
        h_b = h2d.astype(mm_dtype)                          # single bf16 copy per step

        # fused per-relation transform: one (TBN, D) x (D, C*D) matmul
        hw_all = mm(h_b, w_rel_cat_ref[...]) + b_rel_cat_ref[...]   # (TBN, C*D) f32
        msg = ximg
        for c in range(C):
            hw_c = hw_all[:, c * D:(c + 1) * D]             # (TBN, D) static lane slice
            msg = msg + mm(adj_scr[c], hw_c)

        # fused GRU gates: 2 matmuls with lane-dense (3D) outputs
        xzrn = mm(msg, w_gx_cat_ref[...]) + b_g_cat_ref[...]        # (TBN, 3D)
        hzrn = mm(h_b, w_gh_cat_ref[...])                           # (TBN, 3D)
        z = jax.nn.sigmoid(xzrn[:, :D] + hzrn[:, :D])
        r = jax.nn.sigmoid(xzrn[:, D:2 * D] + hzrn[:, D:2 * D])
        n_ = jnp.tanh(xzrn[:, 2 * D:] + r * hzrn[:, 2 * D:])
        h2d = (1.0 - z) * h2d + z * n_

    # --- readout: node-mean (0/1 sum matmul + exact f32 1/N) + SSL feature ---
    g = mm(pool_b_ref[...], h2d.astype(mm_dtype)) * inv_node        # (TB, D)
    out = (mm(g, w_cls_ref[...])
           + mm(feat_ssl_ref[...], w_ssl_ref[...])
           + b_cls_ref[...])
    scores_ref[...] = out.astype(scores_ref.dtype)


def init_params(key, hidden_dim, num_class):
    D, C = hidden_dim, num_class
    ks = jax.random.split(key, 8)
    s = 0.05
    return dict(
        w_edge=jax.random.normal(ks[0], (C, D), jnp.float32) * s,
        w_img=jax.random.normal(ks[1], (D, D), jnp.float32) * s,
        w_rel=jax.random.normal(ks[2], (C, D, D), jnp.float32) * s,
        b_rel=jnp.zeros((C, D), jnp.float32),
        w_gru_x=jax.random.normal(ks[3], (3, D, D), jnp.float32) * s,
        w_gru_h=jax.random.normal(ks[4], (3, D, D), jnp.float32) * s,
        b_gru=jnp.zeros((3, D), jnp.float32),
        w_cls=jax.random.normal(ks[5], (D, C), jnp.float32) * s,
        w_ssl=jax.random.normal(ks[6], (D, C), jnp.float32) * s,
        b_cls=jnp.zeros((1, C), jnp.float32),
    )


def _choose_tb(B, N, D, C, *, target_rows=128, vmem_budget=24 << 20):
    """Pick the batch-stacking factor TB.

    Fill the MXU M dimension (TB*N ~ target_rows), but cap TB where the dense
    block-diagonal adjacency (O(TB^2*N^3) constants / O(TB^2) matmul FLOPs)
    stops paying off or blows the VMEM budget, and keep G >= 2 when B >= 2 so
    both TensorCores on v7x get a grid step.
    """
    tb = max(1, min(B, max(1, target_rows // max(N, 1))))

    def est_bytes(tb):
        tbn, tbnn = tb * N, tb * N * N
        const_b = ((C + 1) * tbnn * tbn + C * C * tbn + 2 * tb * tbn) * 2   # bf16 consts
        scratch_b = C * tbn * tbn * 4                                       # f32 adjacency
        stream_b = 2 * 4 * (tbn * D + tbnn * D + 2 * tb * D + tbnn)         # 2x-buffered f32
        weight_b = (D * C + D * D + D * C * D + 2 * D * 3 * D + 2 * D * C) * 2 \
                   + (C * D + 3 * D + C) * 4
        live_b = tbnn * C * tbn * 6                                         # in-kernel X temps
        return const_b + scratch_b + stream_b + weight_b + live_b

    while tb > 1 and est_bytes(tb) > vmem_budget:
        tb -= 1
    if B >= 2 and -(-B // tb) < 2:          # G would be 1 -> split for v7x megacore
        tb = -(-B // 2)
    return tb


def sergcn_forward(rois_feature, union_feat, full_mask, params, *,
                   time_step=3, use_bf16=True):
    """SERGCN.forward: slicing / weight fusion in JAX glue, RGCN hot path in Pallas."""
    B, n_plus_2, D = rois_feature.shape
    N = n_plus_2 - 2
    C = params["w_edge"].shape[0]        # edge_types (== num_class)
    NC = params["w_cls"].shape[1]        # num_class

    w_dtype = jnp.bfloat16 if use_bf16 else jnp.float32

    # --- SERGCN.forward slicing (plain JAX glue) ---
    feat_body = rois_feature[:, :-2, :]                    # (B, N, D)
    feat_img_1 = union_feat[:, :-1, :-1, :]                # (B, N, N, D)
    feat_img_2 = rois_feature[:, -2, :]                    # (B, D)
    feat_img_ssl = rois_feature[:, -1, :]                  # (B, D)

    # --- batch stacking: TB batch elements per grid step ---
    TB = _choose_tb(B, N, D, C)
    G = (B + TB - 1) // TB
    Bp = G * TB
    if Bp != B:
        pad = Bp - B
        feat_body = jnp.pad(feat_body, ((0, pad), (0, 0), (0, 0)))
        feat_img_1 = jnp.pad(feat_img_1, ((0, pad), (0, 0), (0, 0), (0, 0)))
        feat_img_2 = jnp.pad(feat_img_2, ((0, pad), (0, 0)))
        feat_img_ssl = jnp.pad(feat_img_ssl, ((0, pad), (0, 0)))
        full_mask = jnp.pad(full_mask, ((0, pad), (0, 0), (0, 0)))

    TBN, TBNN = TB * N, TB * N * N

    # lane-dense 2-D slabs per grid step (reshaped outside the kernel)
    body2 = feat_body.reshape(G, TBN, D)
    img12 = feat_img_1.reshape(G, TBNN, D)
    img2 = feat_img_2.reshape(G, TB, D)
    ssl2 = feat_img_ssl.reshape(G, TB, D)
    mask2 = full_mask.reshape(G, TBNN, 1).astype(jnp.float32)

    # --- constant 0/1 selection matrices in bf16 (exact; MXU layout shuffles) ---
    p = jnp.arange(TBNN)
    p_b, p_i, p_j = p // (N * N), (p // N) % N, p % N
    q = jnp.arange(TBN)
    q_b, q_x = q // N, q % N
    r_big = ((p_b[:, None] == q_b[None, :]) &
             (p_j[:, None] == q_x[None, :])).astype(w_dtype)              # (TBNN, TBN)
    r_rep = jnp.tile(r_big, (1, C))                                        # (TBNN, C*TBN)
    qt_big = ((q_b[:, None] == p_b[None, :]) &
              (q_x[:, None] == p_i[None, :])).astype(w_dtype)              # (TBN, TBNN)
    expand_c = (jnp.arange(C)[:, None] ==
                (jnp.arange(C * TBN)[None, :] // TBN)).astype(w_dtype)     # (C, C*TBN)
    exp_b = (q_b[:, None] == jnp.arange(TB)[None, :]).astype(w_dtype)      # (TBN, TB)
    pool_b = exp_b.T                                                       # (TB, TBN) 0/1 sum

    # --- weight fusion: concatenate relation / GRU weights along lanes, bf16 ---
    w_edge_t = params["w_edge"].T.astype(w_dtype)                          # (D, C)
    w_img = params["w_img"].astype(w_dtype)
    w_rel_cat = jnp.transpose(params["w_rel"], (1, 0, 2)).reshape(D, C * D).astype(w_dtype)
    b_rel_cat = params["b_rel"].reshape(1, C * D)                          # f32
    w_gx_cat = jnp.transpose(params["w_gru_x"], (1, 0, 2)).reshape(D, 3 * D).astype(w_dtype)
    w_gh_cat = jnp.transpose(params["w_gru_h"], (1, 0, 2)).reshape(D, 3 * D).astype(w_dtype)
    b_g_cat = params["b_gru"].reshape(1, 3 * D)                            # f32
    w_cls = params["w_cls"].astype(w_dtype)
    w_ssl = params["w_ssl"].astype(w_dtype)
    b_cls = params["b_cls"]                                                # f32

    kernel = functools.partial(
        _rgcn_kernel, time_step=time_step, edge_types=C,
        inv_node=1.0 / float(N), use_bf16=use_bf16)

    def tiled(shape):
        return pl.BlockSpec((None,) + shape, lambda g: (g,) + (0,) * len(shape))

    def full(shape):
        return pl.BlockSpec(shape, lambda g: (0,) * len(shape))

    in_specs = [
        tiled((TBN, D)),               # feat_body
        tiled((TBNN, D)),              # feat_img_1
        tiled((TB, D)),                # feat_img_2
        tiled((TB, D)),                # feat_img_ssl
        tiled((TBNN, 1)),              # mask
        full((TBNN, C * TBN)),         # r_rep
        full((TBN, TBNN)),             # qt_big
        full((C, C * TBN)),            # expand_c
        full((TBN, TB)),               # exp_b
        full((TB, TBN)),               # pool_b
        full((D, C)),                  # w_edge_t
        full((D, D)),                  # w_img
        full((D, C * D)),              # w_rel_cat
        full((1, C * D)),              # b_rel_cat
        full((D, 3 * D)),              # w_gx_cat
        full((D, 3 * D)),              # w_gh_cat
        full((1, 3 * D)),              # b_g_cat
        full((D, NC)),                 # w_cls
        full((D, NC)),                 # w_ssl
        full((1, NC)),                 # b_cls
    ]
    out_spec = pl.BlockSpec((None, TB, NC), lambda g: (g, 0, 0))

    out = pl.pallas_call(
        kernel,
        out_shape=jax.ShapeDtypeStruct((G, TB, NC), jnp.float32),
        grid=(G,),
        in_specs=in_specs,
        out_specs=out_spec,
        scratch_shapes=[pltpu.VMEM((C, TBN, TBN), jnp.float32)],
        compiler_params=pltpu.CompilerParams(
            dimension_semantics=("parallel",),
            vmem_limit_bytes=32 * 1024 * 1024),
    )(
        body2, img12, img2, ssl2, mask2,
        r_rep, qt_big, expand_c, exp_b, pool_b,
        w_edge_t, w_img, w_rel_cat, b_rel_cat,
        w_gx_cat, w_gh_cat, b_g_cat,
        w_cls, w_ssl, b_cls,
    )

    return out.reshape(Bp, NC)[:B]


if __name__ == "__main__":
    # Small, forward-consistent shapes.
    B = 2
    num_class = 5
    node_num = 5
    hidden_dim = 32
    time_step = 3

    key = jax.random.PRNGKey(0)
    k1, k2, k3, kp = jax.random.split(key, 4)

    rois_feature = jax.random.normal(k1, (B, node_num + 2, hidden_dim), jnp.float32)
    union_feat = jax.random.normal(
        k2, (B, node_num + 1, node_num + 1, hidden_dim), jnp.float32)
    full_mask = (jax.random.uniform(k3, (B, node_num, node_num)) > 0.3).astype(jnp.float32)

    params = init_params(kp, hidden_dim, num_class)

    graph_scores = sergcn_forward(
        rois_feature, union_feat, full_mask, params, time_step=time_step)
    graph_scores = jax.block_until_ready(graph_scores)

    assert graph_scores.shape == (B, num_class)
    assert bool(jnp.all(jnp.isfinite(graph_scores)))
    print("KERNEL_OK")
</pallas_src>

<mosaic_0001>
module attributes {stable_mosaic.version = 11 : i64} {
  func.func @_rgcn_kernel(%arg0: i32, %arg1: memref<1x5x32xf32, #tpu.memory_space<vmem>>, %arg2: memref<1x25x32xf32, #tpu.memory_space<vmem>>, %arg3: memref<1x1x32xf32, #tpu.memory_space<vmem>>, %arg4: memref<1x1x32xf32, #tpu.memory_space<vmem>>, %arg5: memref<1x25x1xf32, #tpu.memory_space<vmem>>, %arg6: memref<25x25xbf16, #tpu.memory_space<vmem>>, %arg7: memref<5x25xbf16, #tpu.memory_space<vmem>>, %arg8: memref<5x25xbf16, #tpu.memory_space<vmem>>, %arg9: memref<5x1xbf16, #tpu.memory_space<vmem>>, %arg10: memref<1x5xbf16, #tpu.memory_space<vmem>>, %arg11: memref<32x5xbf16, #tpu.memory_space<vmem>>, %arg12: memref<32x32xbf16, #tpu.memory_space<vmem>>, %arg13: memref<32x160xbf16, #tpu.memory_space<vmem>>, %arg14: memref<1x160xf32, #tpu.memory_space<vmem>>, %arg15: memref<32x96xbf16, #tpu.memory_space<vmem>>, %arg16: memref<32x96xbf16, #tpu.memory_space<vmem>>, %arg17: memref<1x96xf32, #tpu.memory_space<vmem>>, %arg18: memref<32x5xbf16, #tpu.memory_space<vmem>>, %arg19: memref<32x5xbf16, #tpu.memory_space<vmem>>, %arg20: memref<1x5xf32, #tpu.memory_space<vmem>>, %arg21: memref<1x1x5xf32, #tpu.memory_space<vmem>>, %arg22: memref<5x5x5xf32, #tpu.memory_space<vmem>>) attributes {dimension_semantics = [#tpu.dimension_semantics<parallel>], iteration_bounds = array<i64: 2>, scalar_prefetch = 0 : i64, scratch_operands = 1 : i64, tpu.core_type = #tpu.core_type<tc>, window_params = [{transform_indices = @transform_0, window_bounds = array<i64: 1, 5, 32>}, {transform_indices = @transform_1, window_bounds = array<i64: 1, 25, 32>}, {transform_indices = @transform_2, window_bounds = array<i64: 1, 1, 32>}, {transform_indices = @transform_3, window_bounds = array<i64: 1, 1, 32>}, {transform_indices = @transform_4, window_bounds = array<i64: 1, 25, 1>}, {pipeline_mode = #tpu.pipeline_mode<synchronous>, transform_indices = @transform_5, window_bounds = array<i64: 25, 25>}, {pipeline_mode = #tpu.pipeline_mode<synchronous>, transform_indices = @transform_6, window_bounds = array<i64: 5, 25>}, {pipeline_mode = #tpu.pipeline_mode<synchronous>, transform_indices = @transform_7, window_bounds = array<i64: 5, 25>}, {pipeline_mode = #tpu.pipeline_mode<synchronous>, transform_indices = @transform_8, window_bounds = array<i64: 5, 1>}, {pipeline_mode = #tpu.pipeline_mode<synchronous>, transform_indices = @transform_9, window_bounds = array<i64: 1, 5>}, {pipeline_mode = #tpu.pipeline_mode<synchronous>, transform_indices = @transform_10, window_bounds = array<i64: 32, 5>}, {pipeline_mode = #tpu.pipeline_mode<synchronous>, transform_indices = @transform_11, window_bounds = array<i64: 32, 32>}, {pipeline_mode = #tpu.pipeline_mode<synchronous>, transform_indices = @transform_12, window_bounds = array<i64: 32, 160>}, {pipeline_mode = #tpu.pipeline_mode<synchronous>, transform_indices = @transform_13, window_bounds = array<i64: 1, 160>}, {pipeline_mode = #tpu.pipeline_mode<synchronous>, transform_indices = @transform_14, window_bounds = array<i64: 32, 96>}, {pipeline_mode = #tpu.pipeline_mode<synchronous>, transform_indices = @transform_15, window_bounds = array<i64: 32, 96>}, {pipeline_mode = #tpu.pipeline_mode<synchronous>, transform_indices = @transform_16, window_bounds = array<i64: 1, 96>}, {pipeline_mode = #tpu.pipeline_mode<synchronous>, transform_indices = @transform_17, window_bounds = array<i64: 32, 5>}, {pipeline_mode = #tpu.pipeline_mode<synchronous>, transform_indices = @transform_18, window_bounds = array<i64: 32, 5>}, {pipeline_mode = #tpu.pipeline_mode<synchronous>, transform_indices = @transform_19, window_bounds = array<i64: 1, 5>}, {transform_indices = @transform_20, window_bounds = array<i64: 1, 1, 5>}]} {
    %c0 = arith.constant 0 : index
    %c0_0 = arith.constant 0 : index
    %c0_1 = arith.constant 0 : index
    %0 = vector.load %arg2[%c0, %c0_0, %c0_1] : memref<1x25x32xf32, #tpu.memory_space<vmem>>, vector<1x25x32xf32>
    %1 = vector.shape_cast %0 : vector<1x25x32xf32> to vector<25x32xf32>
    %c0_2 = arith.constant 0 : index
    %c0_3 = arith.constant 0 : index
    %2 = vector.load %arg11[%c0_2, %c0_3] : memref<32x5xbf16, #tpu.memory_space<vmem>>, vector<32x5xbf16>
    %3 = arith.truncf %1 : vector<25x32xf32> to vector<25x32xbf16>
    %cst = arith.constant dense<0.000000e+00> : vector<25x5xf32>
    %4 = tpu.matmul %3, %2, %cst {dimension_numbers = #tpu.dot_dimension_numbers<[1], [0], [0], [1], [0, 0, 1, 1], [], []>} : vector<25x32xbf16>, vector<32x5xbf16>, vector<25x5xf32> -> vector<25x5xf32>
    %cst_4 = arith.constant dense<0xFF800000> : vector<25xf32>
    %5 = vector.multi_reduction <maximumf>, %4, %cst_4 [1] : vector<25x5xf32> to vector<25xf32>
    %6 = vector.shape_cast %5 : vector<25xf32> to vector<25x1xf32>
    %7 = vector.broadcast %6 : vector<25x1xf32> to vector<25x5xf32>
    %8 = arith.subf %4, %7 : vector<25x5xf32>
    %9 = math.exp %8 : vector<25x5xf32>
    %cst_5 = arith.constant dense<0.000000e+00> : vector<25xf32>
    %10 = vector.multi_reduction <add>, %9, %cst_5 [1] : vector<25x5xf32> to vector<25xf32>
    %11 = vector.shape_cast %10 : vector<25xf32> to vector<25x1xf32>
    %12 = tpu.reciprocal %11 {approx = true} : vector<25x1xf32> -> vector<25x1xf32>
    %13 = vector.broadcast %12 : vector<25x1xf32> to vector<25x5xf32>
    %14 = arith.mulf %9, %13 : vector<25x5xf32>
    %c0_6 = arith.constant 0 : index
    %c0_7 = arith.constant 0 : index
    %c0_8 = arith.constant 0 : index
    %15 = vector.load %arg5[%c0_6, %c0_7, %c0_8] : memref<1x25x1xf32, #tpu.memory_space<vmem>>, vector<1x25x1xf32>
    %16 = vector.shape_cast %15 : vector<1x25x1xf32> to vector<25x1xf32>
    %17 = vector.broadcast %16 : vector<25x1xf32> to vector<25x5xf32>
    %18 = arith.mulf %14, %17 : vector<25x5xf32>
    %c0_9 = arith.constant 0 : index
    %c0_10 = arith.constant 0 : index
    %19 = vector.load %arg8[%c0_9, %c0_10] : memref<5x25xbf16, #tpu.memory_space<vmem>>, vector<5x25xbf16>
    %20 = arith.truncf %18 : vector<25x5xf32> to vector<25x5xbf16>
    %cst_11 = arith.constant dense<0.000000e+00> : vector<25x25xf32>
    %21 = tpu.matmul %20, %19, %cst_11 {dimension_numbers = #tpu.dot_dimension_numbers<[1], [0], [0], [1], [0, 0, 1, 1], [], []>} : vector<25x5xbf16>, vector<5x25xbf16>, vector<25x25xf32> -> vector<25x25xf32>
    %22 = arith.truncf %21 : vector<25x25xf32> to vector<25x25xbf16>
    %c0_12 = arith.constant 0 : index
    %c0_13 = arith.constant 0 : index
    %23 = vector.load %arg6[%c0_12, %c0_13] : memref<25x25xbf16, #tpu.memory_space<vmem>>, vector<25x25xbf16>
    %24 = arith.mulf %22, %23 : vector<25x25xbf16>
    %c0_14 = arith.constant 0 : index
    %c0_15 = arith.constant 0 : index
    %25 = vector.load %arg7[%c0_14, %c0_15] : memref<5x25xbf16, #tpu.memory_space<vmem>>, vector<5x25xbf16>
    %cst_16 = arith.constant dense<0.000000e+00> : vector<5x25xf32>
    %26 = tpu.matmul %25, %24, %cst_16 {dimension_numbers = #tpu.dot_dimension_numbers<[1], [0], [0], [1], [0, 0, 1, 1], [], []>} : vector<5x25xbf16>, vector<25x25xbf16>, vector<5x25xf32> -> vector<5x25xf32>
    %27 = vector.extract_strided_slice %26 {offsets = [0, 0], sizes = [5, 5], strides = [1, 1]} : vector<5x25xf32> to vector<5x5xf32>
    %c0_17 = arith.constant 0 : index
    %c0_18 = arith.constant 0 : index
    %c0_19 = arith.constant 0 : index
    %28 = vector.load %arg22[%c0_17, %c0_18, %c0_19] : memref<5x5x5xf32, #tpu.memory_space<vmem>>, vector<1x5x5xf32>
    %29 = vector.shape_cast %28 : vector<1x5x5xf32> to vector<5x5xf32>
    %30 = vector.shape_cast %27 : vector<5x5xf32> to vector<1x5x5xf32>
    tpu.vector_store %arg22[%c0_17, %c0_18, %c0_19], %30 {strides = array<i32>} : memref<5x5x5xf32, #tpu.memory_space<vmem>>, vector<1x5x5xf32>,
    %31 = vector.extract_strided_slice %26 {offsets = [0, 5], sizes = [5, 5], strides = [1, 1]} : vector<5x25xf32> to vector<5x5xf32>
    %c1 = arith.constant 1 : index
    %c0_20 = arith.constant 0 : index
    %c0_21 = arith.constant 0 : index
    %32 = vector.load %arg22[%c1, %c0_20, %c0_21] : memref<5x5x5xf32, #tpu.memory_space<vmem>>, vector<1x5x5xf32>
    %33 = vector.shape_cast %32 : vector<1x5x5xf32> to vector<5x5xf32>
    %34 = vector.shape_cast %31 : vector<5x5xf32> to vector<1x5x5xf32>
    tpu.vector_store %arg22[%c1, %c0_20, %c0_21], %34 {strides = array<i32>} : memref<5x5x5xf32, #tpu.memory_space<vmem>>, vector<1x5x5xf32>,
    %35 = vector.extract_strided_slice %26 {offsets = [0, 10], sizes = [5, 5], strides = [1, 1]} : vector<5x25xf32> to vector<5x5xf32>
    %c2 = arith.constant 2 : index
    %c0_22 = arith.constant 0 : index
    %c0_23 = arith.constant 0 : index
    %36 = vector.load %arg22[%c2, %c0_22, %c0_23] : memref<5x5x5xf32, #tpu.memory_space<vmem>>, vector<1x5x5xf32>
    %37 = vector.shape_cast %36 : vector<1x5x5xf32> to vector<5x5xf32>
    %38 = vector.shape_cast %35 : vector<5x5xf32> to vector<1x5x5xf32>
    tpu.vector_store %arg22[%c2, %c0_22, %c0_23], %38 {strides = array<i32>} : memref<5x5x5xf32, #tpu.memory_space<vmem>>, vector<1x5x5xf32>,
    %39 = vector.extract_strided_slice %26 {offsets = [0, 15], sizes = [5, 5], strides = [1, 1]} : vector<5x25xf32> to vector<5x5xf32>
    %c3 = arith.constant 3 : index
    %c0_24 = arith.constant 0 : index
    %c0_25 = arith.constant 0 : index
    %40 = vector.load %arg22[%c3, %c0_24, %c0_25] : memref<5x5x5xf32, #tpu.memory_space<vmem>>, vector<1x5x5xf32>
    %41 = vector.shape_cast %40 : vector<1x5x5xf32> to vector<5x5xf32>
    %42 = vector.shape_cast %39 : vector<5x5xf32> to vector<1x5x5xf32>
    tpu.vector_store %arg22[%c3, %c0_24, %c0_25], %42 {strides = array<i32>} : memref<5x5x5xf32, #tpu.memory_space<vmem>>, vector<1x5x5xf32>,
    %43 = vector.extract_strided_slice %26 {offsets = [0, 20], sizes = [5, 5], strides = [1, 1]} : vector<5x25xf32> to vector<5x5xf32>
    %c4 = arith.constant 4 : index
    %c0_26 = arith.constant 0 : index
    %c0_27 = arith.constant 0 : index
    %44 = vector.load %arg22[%c4, %c0_26, %c0_27] : memref<5x5x5xf32, #tpu.memory_space<vmem>>, vector<1x5x5xf32>
    %45 = vector.shape_cast %44 : vector<1x5x5xf32> to vector<5x5xf32>
    %46 = vector.shape_cast %43 : vector<5x5xf32> to vector<1x5x5xf32>
    tpu.vector_store %arg22[%c4, %c0_26, %c0_27], %46 {strides = array<i32>} : memref<5x5x5xf32, #tpu.memory_space<vmem>>, vector<1x5x5xf32>,
    %c0_28 = arith.constant 0 : index
    %c0_29 = arith.constant 0 : index
    %c0_30 = arith.constant 0 : index
    %47 = vector.load %arg3[%c0_28, %c0_29, %c0_30] : memref<1x1x32xf32, #tpu.memory_space<vmem>>, vector<1x1x32xf32>
    %48 = vector.shape_cast %47 : vector<1x1x32xf32> to vector<1x32xf32>
    %c0_31 = arith.constant 0 : index
    %c0_32 = arith.constant 0 : index
    %49 = vector.load %arg12[%c0_31, %c0_32] : memref<32x32xbf16, #tpu.memory_space<vmem>>, vector<32x32xbf16>
    %50 = arith.truncf %48 : vector<1x32xf32> to vector<1x32xbf16>
    %cst_33 = arith.constant dense<0.000000e+00> : vector<1x32xf32>
    %51 = tpu.matmul %50, %49, %cst_33 {dimension_numbers = #tpu.dot_dimension_numbers<[1], [0], [0], [1], [0, 0, 1, 1], [], []>} : vector<1x32xbf16>, vector<32x32xbf16>, vector<1x32xf32> -> vector<1x32xf32>
    %c0_34 = arith.constant 0 : index
    %c0_35 = arith.constant 0 : index
    %52 = vector.load %arg9[%c0_34, %c0_35] : memref<5x1xbf16, #tpu.memory_space<vmem>>, vector<5x1xbf16>
    %53 = arith.truncf %51 : vector<1x32xf32> to vector<1x32xbf16>
    %cst_36 = arith.constant dense<0.000000e+00> : vector<5x32xf32>
    %54 = tpu.matmul %52, %53, %cst_36 {dimension_numbers = #tpu.dot_dimension_numbers<[1], [0], [0], [1], [0, 0, 1, 1], [], []>} : vector<5x1xbf16>, vector<1x32xbf16>, vector<5x32xf32> -> vector<5x32xf32>
    %c0_37 = arith.constant 0 : index
    %c0_38 = arith.constant 0 : index
    %c0_39 = arith.constant 0 : index
    %55 = vector.load %arg1[%c0_37, %c0_38, %c0_39] : memref<1x5x32xf32, #tpu.memory_space<vmem>>, vector<1x5x32xf32>
    %56 = vector.shape_cast %55 : vector<1x5x32xf32> to vector<5x32xf32>
    %57 = arith.truncf %56 : vector<5x32xf32> to vector<5x32xbf16>
    %c0_40 = arith.constant 0 : index
    %c0_41 = arith.constant 0 : index
    %58 = vector.load %arg13[%c0_40, %c0_41] : memref<32x160xbf16, #tpu.memory_space<vmem>>, vector<32x160xbf16>
    %cst_42 = arith.constant dense<0.000000e+00> : vector<5x160xf32>
    %59 = tpu.matmul %57, %58, %cst_42 {dimension_numbers = #tpu.dot_dimension_numbers<[1], [0], [0], [1], [0, 0, 1, 1], [], []>} : vector<5x32xbf16>, vector<32x160xbf16>, vector<5x160xf32> -> vector<5x160xf32>
    %c0_43 = arith.constant 0 : index
    %c0_44 = arith.constant 0 : index
    %60 = vector.load %arg14[%c0_43, %c0_44] : memref<1x160xf32, #tpu.memory_space<vmem>>, vector<1x160xf32>
    %61 = vector.broadcast %60 : vector<1x160xf32> to vector<5x160xf32>
    %62 = arith.addf %59, %61 : vector<5x160xf32>
    %63 = vector.extract_strided_slice %62 {offsets = [0, 0], sizes = [5, 32], strides = [1, 1]} : vector<5x160xf32> to vector<5x32xf32>
    %c0_45 = arith.constant 0 : index
    %c0_46 = arith.constant 0 : index
    %c0_47 = arith.constant 0 : index
    %64 = vector.load %arg22[%c0_45, %c0_46, %c0_47] : memref<5x5x5xf32, #tpu.memory_space<vmem>>, vector<1x5x5xf32>
    %65 = vector.shape_cast %64 : vector<1x5x5xf32> to vector<5x5xf32>
    %66 = arith.truncf %65 : vector<5x5xf32> to vector<5x5xbf16>
    %67 = arith.truncf %63 : vector<5x32xf32> to vector<5x32xbf16>
    %cst_48 = arith.constant dense<0.000000e+00> : vector<5x32xf32>
    %68 = tpu.matmul %66, %67, %cst_48 {dimension_numbers = #tpu.dot_dimension_numbers<[1], [0], [0], [1], [0, 0, 1, 1], [], []>} : vector<5x5xbf16>, vector<5x32xbf16>, vector<5x32xf32> -> vector<5x32xf32>
    %69 = arith.addf %54, %68 : vector<5x32xf32>
    %70 = vector.extract_strided_slice %62 {offsets = [0, 32], sizes = [5, 32], strides = [1, 1]} : vector<5x160xf32> to vector<5x32xf32>
    %c1_49 = arith.constant 1 : index
    %c0_50 = arith.constant 0 : index
    %c0_51 = arith.constant 0 : index
    %71 = vector.load %arg22[%c1_49, %c0_50, %c0_51] : memref<5x5x5xf32, #tpu.memory_space<vmem>>, vector<1x5x5xf32>
    %72 = vector.shape_cast %71 : vector<1x5x5xf32> to vector<5x5xf32>
    %73 = arith.truncf %72 : vector<5x5xf32> to vector<5x5xbf16>
    %74 = arith.truncf %70 : vector<5x32xf32> to vector<5x32xbf16>
    %cst_52 = arith.constant dense<0.000000e+00> : vector<5x32xf32>
    %75 = tpu.matmul %73, %74, %cst_52 {dimension_numbers = #tpu.dot_dimension_numbers<[1], [0], [0], [1], [0, 0, 1, 1], [], []>} : vector<5x5xbf16>, vector<5x32xbf16>, vector<5x32xf32> -> vector<5x32xf32>
    %76 = arith.addf %69, %75 : vector<5x32xf32>
    %77 = vector.extract_strided_slice %62 {offsets = [0, 64], sizes = [5, 32], strides = [1, 1]} : vector<5x160xf32> to vector<5x32xf32>
    %c2_53 = arith.constant 2 : index
    %c0_54 = arith.constant 0 : index
    %c0_55 = arith.constant 0 : index
    %78 = vector.load %arg22[%c2_53, %c0_54, %c0_55] : memref<5x5x5xf32, #tpu.memory_space<vmem>>, vector<1x5x5xf32>
    %79 = vector.shape_cast %78 : vector<1x5x5xf32> to vector<5x5xf32>
    %80 = arith.truncf %79 : vector<5x5xf32> to vector<5x5xbf16>
    %81 = arith.truncf %77 : vector<5x32xf32> to vector<5x32xbf16>
    %cst_56 = arith.constant dense<0.000000e+00> : vector<5x32xf32>
    %82 = tpu.matmul %80, %81, %cst_56 {dimension_numbers = #tpu.dot_dimension_numbers<[1], [0], [0], [1], [0, 0, 1, 1], [], []>} : vector<5x5xbf16>, vector<5x32xbf16>, vector<5x32xf32> -> vector<5x32xf32>
    %83 = arith.addf %76, %82 : vector<5x32xf32>
    %84 = vector.extract_strided_slice %62 {offsets = [0, 96], sizes = [5, 32], strides = [1, 1]} : vector<5x160xf32> to vector<5x32xf32>
    %c3_57 = arith.constant 3 : index
    %c0_58 = arith.constant 0 : index
    %c0_59 = arith.constant 0 : index
    %85 = vector.load %arg22[%c3_57, %c0_58, %c0_59] : memref<5x5x5xf32, #tpu.memory_space<vmem>>, vector<1x5x5xf32>
    %86 = vector.shape_cast %85 : vector<1x5x5xf32> to vector<5x5xf32>
    %87 = arith.truncf %86 : vector<5x5xf32> to vector<5x5xbf16>
    %88 = arith.truncf %84 : vector<5x32xf32> to vector<5x32xbf16>
    %cst_60 = arith.constant dense<0.000000e+00> : vector<5x32xf32>
    %89 = tpu.matmul %87, %88, %cst_60 {dimension_numbers = #tpu.dot_dimension_numbers<[1], [0], [0], [1], [0, 0, 1, 1], [], []>} : vector<5x5xbf16>, vector<5x32xbf16>, vector<5x32xf32> -> vector<5x32xf32>
    %90 = arith.addf %83, %89 : vector<5x32xf32>
    %91 = vector.extract_strided_slice %62 {offsets = [0, 128], sizes = [5, 32], strides = [1, 1]} : vector<5x160xf32> to vector<5x32xf32>
    %c4_61 = arith.constant 4 : index
    %c0_62 = arith.constant 0 : index
    %c0_63 = arith.constant 0 : index
    %92 = vector.load %arg22[%c4_61, %c0_62, %c0_63] : memref<5x5x5xf32, #tpu.memory_space<vmem>>, vector<1x5x5xf32>
    %93 = vector.shape_cast %92 : vector<1x5x5xf32> to vector<5x5xf32>
    %94 = arith.truncf %93 : vector<5x5xf32> to vector<5x5xbf16>
    %95 = arith.truncf %91 : vector<5x32xf32> to vector<5x32xbf16>
    %cst_64 = arith.constant dense<0.000000e+00> : vector<5x32xf32>
    %96 = tpu.matmul %94, %95, %cst_64 {dimension_numbers = #tpu.dot_dimension_numbers<[1], [0], [0], [1], [0, 0, 1, 1], [], []>} : vector<5x5xbf16>, vector<5x32xbf16>, vector<5x32xf32> -> vector<5x32xf32>
    %97 = arith.addf %90, %96 : vector<5x32xf32>
    %c0_65 = arith.constant 0 : index
    %c0_66 = arith.constant 0 : index
    %98 = vector.load %arg15[%c0_65, %c0_66] : memref<32x96xbf16, #tpu.memory_space<vmem>>, vector<32x96xbf16>
    %99 = arith.truncf %97 : vector<5x32xf32> to vector<5x32xbf16>
    %cst_67 = arith.constant dense<0.000000e+00> : vector<5x96xf32>
    %100 = tpu.matmul %99, %98, %cst_67 {dimension_numbers = #tpu.dot_dimension_numbers<[1], [0], [0], [1], [0, 0, 1, 1], [], []>} : vector<5x32xbf16>, vector<32x96xbf16>, vector<5x96xf32> -> vector<5x96xf32>
    %c0_68 = arith.constant 0 : index
    %c0_69 = arith.constant 0 : index
    %101 = vector.load %arg17[%c0_68, %c0_69] : memref<1x96xf32, #tpu.memory_space<vmem>>, vector<1x96xf32>
    %102 = vector.broadcast %101 : vector<1x96xf32> to vector<5x96xf32>
    %103 = arith.addf %100, %102 : vector<5x96xf32>
    %c0_70 = arith.constant 0 : index
    %c0_71 = arith.constant 0 : index
    %104 = vector.load %arg16[%c0_70, %c0_71] : memref<32x96xbf16, #tpu.memory_space<vmem>>, vector<32x96xbf16>
    %cst_72 = arith.constant dense<0.000000e+00> : vector<5x96xf32>
    %105 = tpu.matmul %57, %104, %cst_72 {dimension_numbers = #tpu.dot_dimension_numbers<[1], [0], [0], [1], [0, 0, 1, 1], [], []>} : vector<5x32xbf16>, vector<32x96xbf16>, vector<5x96xf32> -> vector<5x96xf32>
    %106 = vector.extract_strided_slice %103 {offsets = [0, 0], sizes = [5, 32], strides = [1, 1]} : vector<5x96xf32> to vector<5x32xf32>
    %107 = vector.extract_strided_slice %105 {offsets = [0, 0], sizes = [5, 32], strides = [1, 1]} : vector<5x96xf32> to vector<5x32xf32>
    %108 = arith.addf %106, %107 : vector<5x32xf32>
    %109 = arith.negf %108 : vector<5x32xf32>
    %110 = math.exp %109 : vector<5x32xf32>
    %cst_73 = arith.constant 1.000000e+00 : f32
    %111 = vector.broadcast %cst_73 : f32 to vector<5x32xf32>
    %112 = arith.addf %111, %110 : vector<5x32xf32>
    %113 = arith.divf %111, %112 : vector<5x32xf32>
    %114 = vector.extract_strided_slice %103 {offsets = [0, 32], sizes = [5, 32], strides = [1, 1]} : vector<5x96xf32> to vector<5x32xf32>
    %115 = vector.extract_strided_slice %105 {offsets = [0, 32], sizes = [5, 32], strides = [1, 1]} : vector<5x96xf32> to vector<5x32xf32>
    %116 = arith.addf %114, %115 : vector<5x32xf32>
    %117 = arith.negf %116 : vector<5x32xf32>
    %118 = math.exp %117 : vector<5x32xf32>
    %cst_74 = arith.constant 1.000000e+00 : f32
    %119 = vector.broadcast %cst_74 : f32 to vector<5x32xf32>
    %120 = arith.addf %119, %118 : vector<5x32xf32>
    %121 = arith.divf %119, %120 : vector<5x32xf32>
    %122 = vector.extract_strided_slice %103 {offsets = [0, 64], sizes = [5, 32], strides = [1, 1]} : vector<5x96xf32> to vector<5x32xf32>
    %123 = vector.extract_strided_slice %105 {offsets = [0, 64], sizes = [5, 32], strides = [1, 1]} : vector<5x96xf32> to vector<5x32xf32>
    %124 = arith.mulf %121, %123 : vector<5x32xf32>
    %125 = arith.addf %122, %124 : vector<5x32xf32>
    %126 = math.tanh %125 : vector<5x32xf32>
    %cst_75 = arith.constant 1.000000e+00 : f32
    %127 = vector.broadcast %cst_75 : f32 to vector<5x32xf32>
    %128 = arith.subf %127, %113 : vector<5x32xf32>
    %129 = arith.mulf %128, %56 : vector<5x32xf32>
    %130 = arith.mulf %113, %126 : vector<5x32xf32>
    %131 = arith.addf %129, %130 : vector<5x32xf32>
    %132 = arith.truncf %131 : vector<5x32xf32> to vector<5x32xbf16>
    %c0_76 = arith.constant 0 : index
    %c0_77 = arith.constant 0 : index
    %133 = vector.load %arg13[%c0_76, %c0_77] : memref<32x160xbf16, #tpu.memory_space<vmem>>, vector<32x160xbf16>
    %cst_78 = arith.constant dense<0.000000e+00> : vector<5x160xf32>
    %134 = tpu.matmul %132, %133, %cst_78 {dimension_numbers = #tpu.dot_dimension_numbers<[1], [0], [0], [1], [0, 0, 1, 1], [], []>} : vector<5x32xbf16>, vector<32x160xbf16>, vector<5x160xf32> -> vector<5x160xf32>
    %c0_79 = arith.constant 0 : index
    %c0_80 = arith.constant 0 : index
    %135 = vector.load %arg14[%c0_79, %c0_80] : memref<1x160xf32, #tpu.memory_space<vmem>>, vector<1x160xf32>
    %136 = vector.broadcast %135 : vector<1x160xf32> to vector<5x160xf32>
    %137 = arith.addf %134, %136 : vector<5x160xf32>
    %138 = vector.extract_strided_slice %137 {offsets = [0, 0], sizes = [5, 32], strides = [1, 1]} : vector<5x160xf32> to vector<5x32xf32>
    %c0_81 = arith.constant 0 : index
    %c0_82 = arith.constant 0 : index
    %c0_83 = arith.constant 0 : index
    %139 = vector.load %arg22[%c0_81, %c0_82, %c0_83] : memref<5x5x5xf32, #tpu.memory_space<vmem>>, vector<1x5x5xf32>
    %140 = vector.shape_cast %139 : vector<1x5x5xf32> to vector<5x5xf32>
    %141 = arith.truncf %140 : vector<5x5xf32> to vector<5x5xbf16>
    %142 = arith.truncf %138 : vector<5x32xf32> to vector<5x32xbf16>
    %cst_84 = arith.constant dense<0.000000e+00> : vector<5x32xf32>
    %143 = tpu.matmul %141, %142, %cst_84 {dimension_numbers = #tpu.dot_dimension_numbers<[1], [0], [0], [1], [0, 0, 1, 1], [], []>} : vector<5x5xbf16>, vector<5x32xbf16>, vector<5x32xf32> -> vector<5x32xf32>
    %144 = arith.addf %54, %143 : vector<5x32xf32>
    %145 = vector.extract_strided_slice %137 {offsets = [0, 32], sizes = [5, 32], strides = [1, 1]} : vector<5x160xf32> to vector<5x32xf32>
    %c1_85 = arith.constant 1 : index
    %c0_86 = arith.constant 0 : index
    %c0_87 = arith.constant 0 : index
    %146 = vector.load %arg22[%c1_85, %c0_86, %c0_87] : memref<5x5x5xf32, #tpu.memory_space<vmem>>, vector<1x5x5xf32>
    %147 = vector.shape_cast %146 : vector<1x5x5xf32> to vector<5x5xf32>
    %148 = arith.truncf %147 : vector<5x5xf32> to vector<5x5xbf16>
    %149 = arith.truncf %145 : vector<5x32xf32> to vector<5x32xbf16>
    %cst_88 = arith.constant dense<0.000000e+00> : vector<5x32xf32>
    %150 = tpu.matmul %148, %149, %cst_88 {dimension_numbers = #tpu.dot_dimension_numbers<[1], [0], [0], [1], [0, 0, 1, 1], [], []>} : vector<5x5xbf16>, vector<5x32xbf16>, vector<5x32xf32> -> vector<5x32xf32>
    %151 = arith.addf %144, %150 : vector<5x32xf32>
    %152 = vector.extract_strided_slice %137 {offsets = [0, 64], sizes = [5, 32], strides = [1, 1]} : vector<5x160xf32> to vector<5x32xf32>
    %c2_89 = arith.constant 2 : index
    %c0_90 = arith.constant 0 : index
    %c0_91 = arith.constant 0 : index
    %153 = vector.load %arg22[%c2_89, %c0_90, %c0_91] : memref<5x5x5xf32, #tpu.memory_space<vmem>>, vector<1x5x5xf32>
    %154 = vector.shape_cast %153 : vector<1x5x5xf32> to vector<5x5xf32>
    %155 = arith.truncf %154 : vector<5x5xf32> to vector<5x5xbf16>
    %156 = arith.truncf %152 : vector<5x32xf32> to vector<5x32xbf16>
    %cst_92 = arith.constant dense<0.000000e+00> : vector<5x32xf32>
    %157 = tpu.matmul %155, %156, %cst_92 {dimension_numbers = #tpu.dot_dimension_numbers<[1], [0], [0], [1], [0, 0, 1, 1], [], []>} : vector<5x5xbf16>, vector<5x32xbf16>, vector<5x32xf32> -> vector<5x32xf32>
    %158 = arith.addf %151, %157 : vector<5x32xf32>
    %159 = vector.extract_strided_slice %137 {offsets = [0, 96], sizes = [5, 32], strides = [1, 1]} : vector<5x160xf32> to vector<5x32xf32>
    %c3_93 = arith.constant 3 : index
    %c0_94 = arith.constant 0 : index
    %c0_95 = arith.constant 0 : index
    %160 = vector.load %arg22[%c3_93, %c0_94, %c0_95] : memref<5x5x5xf32, #tpu.memory_space<vmem>>, vector<1x5x5xf32>
    %161 = vector.shape_cast %160 : vector<1x5x5xf32> to vector<5x5xf32>
    %162 = arith.truncf %161 : vector<5x5xf32> to vector<5x5xbf16>
    %163 = arith.truncf %159 : vector<5x32xf32> to vector<5x32xbf16>
    %cst_96 = arith.constant dense<0.000000e+00> : vector<5x32xf32>
    %164 = tpu.matmul %162, %163, %cst_96 {dimension_numbers = #tpu.dot_dimension_numbers<[1], [0], [0], [1], [0, 0, 1, 1], [], []>} : vector<5x5xbf16>, vector<5x32xbf16>, vector<5x32xf32> -> vector<5x32xf32>
    %165 = arith.addf %158, %164 : vector<5x32xf32>
    %166 = vector.extract_strided_slice %137 {offsets = [0, 128], sizes = [5, 32], strides = [1, 1]} : vector<5x160xf32> to vector<5x32xf32>
    %c4_97 = arith.constant 4 : index
    %c0_98 = arith.constant 0 : index
    %c0_99 = arith.constant 0 : index
    %167 = vector.load %arg22[%c4_97, %c0_98, %c0_99] : memref<5x5x5xf32, #tpu.memory_space<vmem>>, vector<1x5x5xf32>
    %168 = vector.shape_cast %167 : vector<1x5x5xf32> to vector<5x5xf32>
    %169 = arith.truncf %168 : vector<5x5xf32> to vector<5x5xbf16>
    %170 = arith.truncf %166 : vector<5x32xf32> to vector<5x32xbf16>
    %cst_100 = arith.constant dense<0.000000e+00> : vector<5x32xf32>
    %171 = tpu.matmul %169, %170, %cst_100 {dimension_numbers = #tpu.dot_dimension_numbers<[1], [0], [0], [1], [0, 0, 1, 1], [], []>} : vector<5x5xbf16>, vector<5x32xbf16>, vector<5x32xf32> -> vector<5x32xf32>
    %172 = arith.addf %165, %171 : vector<5x32xf32>
    %c0_101 = arith.constant 0 : index
    %c0_102 = arith.constant 0 : index
    %173 = vector.load %arg15[%c0_101, %c0_102] : memref<32x96xbf16, #tpu.memory_space<vmem>>, vector<32x96xbf16>
    %174 = arith.truncf %172 : vector<5x32xf32> to vector<5x32xbf16>
    %cst_103 = arith.constant dense<0.000000e+00> : vector<5x96xf32>
    %175 = tpu.matmul %174, %173, %cst_103 {dimension_numbers = #tpu.dot_dimension_numbers<[1], [0], [0], [1], [0, 0, 1, 1], [], []>} : vector<5x32xbf16>, vector<32x96xbf16>, vector<5x96xf32> -> vector<5x96xf32>
    %c0_104 = arith.constant 0 : index
    %c0_105 = arith.constant 0 : index
    %176 = vector.load %arg17[%c0_104, %c0_105] : memref<1x96xf32, #tpu.memory_space<vmem>>, vector<1x96xf32>
    %177 = vector.broadcast %176 : vector<1x96xf32> to vector<5x96xf32>
    %178 = arith.addf %175, %177 : vector<5x96xf32>
    %c0_106 = arith.constant 0 : index
    %c0_107 = arith.constant 0 : index
    %179 = vector.load %arg16[%c0_106, %c0_107] : memref<32x96xbf16, #tpu.memory_space<vmem>>, vector<32x96xbf16>
    %cst_108 = arith.constant dense<0.000000e+00> : vector<5x96xf32>
    %180 = tpu.matmul %132, %179, %cst_108 {dimension_numbers = #tpu.dot_dimension_numbers<[1], [0], [0], [1], [0, 0, 1, 1], [], []>} : vector<5x32xbf16>, vector<32x96xbf16>, vector<5x96xf32> -> vector<5x96xf32>
    %181 = vector.extract_strided_slice %178 {offsets = [0, 0], sizes = [5, 32], strides = [1, 1]} : vector<5x96xf32> to vector<5x32xf32>
    %182 = vector.extract_strided_slice %180 {offsets = [0, 0], sizes = [5, 32], strides = [1, 1]} : vector<5x96xf32> to vector<5x32xf32>
    %183 = arith.addf %181, %182 : vector<5x32xf32>
    %184 = arith.negf %183 : vector<5x32xf32>
    %185 = math.exp %184 : vector<5x32xf32>
    %cst_109 = arith.constant 1.000000e+00 : f32
    %186 = vector.broadcast %cst_109 : f32 to vector<5x32xf32>
    %187 = arith.addf %186, %185 : vector<5x32xf32>
    %188 = arith.divf %186, %187 : vector<5x32xf32>
    %189 = vector.extract_strided_slice %178 {offsets = [0, 32], sizes = [5, 32], strides = [1, 1]} : vector<5x96xf32> to vector<5x32xf32>
    %190 = vector.extract_strided_slice %180 {offsets = [0, 32], sizes = [5, 32], strides = [1, 1]} : vector<5x96xf32> to vector<5x32xf32>
    %191 = arith.addf %189, %190 : vector<5x32xf32>
    %192 = arith.negf %191 : vector<5x32xf32>
    %193 = math.exp %192 : vector<5x32xf32>
    %cst_110 = arith.constant 1.000000e+00 : f32
    %194 = vector.broadcast %cst_110 : f32 to vector<5x32xf32>
    %195 = arith.addf %194, %193 : vector<5x32xf32>
    %196 = arith.divf %194, %195 : vector<5x32xf32>
    %197 = vector.extract_strided_slice %178 {offsets = [0, 64], sizes = [5, 32], strides = [1, 1]} : vector<5x96xf32> to vector<5x32xf32>
    %198 = vector.extract_strided_slice %180 {offsets = [0, 64], sizes = [5, 32], strides = [1, 1]} : vector<5x96xf32> to vector<5x32xf32>
    %199 = arith.mulf %196, %198 : vector<5x32xf32>
    %200 = arith.addf %197, %199 : vector<5x32xf32>
    %201 = math.tanh %200 : vector<5x32xf32>
    %cst_111 = arith.constant 1.000000e+00 : f32
    %202 = vector.broadcast %cst_111 : f32 to vector<5x32xf32>
    %203 = arith.subf %202, %188 : vector<5x32xf32>
    %204 = arith.mulf %203, %131 : vector<5x32xf32>
    %205 = arith.mulf %188, %201 : vector<5x32xf32>
    %206 = arith.addf %204, %205 : vector<5x32xf32>
    %207 = arith.truncf %206 : vector<5x32xf32> to vector<5x32xbf16>
    %c0_112 = arith.constant 0 : index
    %c0_113 = arith.constant 0 : index
    %208 = vector.load %arg13[%c0_112, %c0_113] : memref<32x160xbf16, #tpu.memory_space<vmem>>, vector<32x160xbf16>
    %cst_114 = arith.constant dense<0.000000e+00> : vector<5x160xf32>
    %209 = tpu.matmul %207, %208, %cst_114 {dimension_numbers = #tpu.dot_dimension_numbers<[1], [0], [0], [1], [0, 0, 1, 1], [], []>} : vector<5x32xbf16>, vector<32x160xbf16>, vector<5x160xf32> -> vector<5x160xf32>
    %c0_115 = arith.constant 0 : index
    %c0_116 = arith.constant 0 : index
    %210 = vector.load %arg14[%c0_115, %c0_116] : memref<1x160xf32, #tpu.memory_space<vmem>>, vector<1x160xf32>
    %211 = vector.broadcast %210 : vector<1x160xf32> to vector<5x160xf32>
    %212 = arith.addf %209, %211 : vector<5x160xf32>
    %213 = vector.extract_strided_slice %212 {offsets = [0, 0], sizes = [5, 32], strides = [1, 1]} : vector<5x160xf32> to vector<5x32xf32>
    %c0_117 = arith.constant 0 : index
    %c0_118 = arith.constant 0 : index
    %c0_119 = arith.constant 0 : index
    %214 = vector.load %arg22[%c0_117, %c0_118, %c0_119] : memref<5x5x5xf32, #tpu.memory_space<vmem>>, vector<1x5x5xf32>
    %215 = vector.shape_cast %214 : vector<1x5x5xf32> to vector<5x5xf32>
    %216 = arith.truncf %215 : vector<5x5xf32> to vector<5x5xbf16>
    %217 = arith.truncf %213 : vector<5x32xf32> to vector<5x32xbf16>
    %cst_120 = arith.constant dense<0.000000e+00> : vector<5x32xf32>
    %218 = tpu.matmul %216, %217, %cst_120 {dimension_numbers = #tpu.dot_dimension_numbers<[1], [0], [0], [1], [0, 0, 1, 1], [], []>} : vector<5x5xbf16>, vector<5x32xbf16>, vector<5x32xf32> -> vector<5x32xf32>
    %219 = arith.addf %54, %218 : vector<5x32xf32>
    %220 = vector.extract_strided_slice %212 {offsets = [0, 32], sizes = [5, 32], strides = [1, 1]} : vector<5x160xf32> to vector<5x32xf32>
    %c1_121 = arith.constant 1 : index
    %c0_122 = arith.constant 0 : index
    %c0_123 = arith.constant 0 : index
    %221 = vector.load %arg22[%c1_121, %c0_122, %c0_123] : memref<5x5x5xf32, #tpu.memory_space<vmem>>, vector<1x5x5xf32>
    %222 = vector.shape_cast %221 : vector<1x5x5xf32> to vector<5x5xf32>
    %223 = arith.truncf %222 : vector<5x5xf32> to vector<5x5xbf16>
    %224 = arith.truncf %220 : vector<5x32xf32> to vector<5x32xbf16>
    %cst_124 = arith.constant dense<0.000000e+00> : vector<5x32xf32>
    %225 = tpu.matmul %223, %224, %cst_124 {dimension_numbers = #tpu.dot_dimension_numbers<[1], [0], [0], [1], [0, 0, 1, 1], [], []>} : vector<5x5xbf16>, vector<5x32xbf16>, vector<5x32xf32> -> vector<5x32xf32>
    %226 = arith.addf %219, %225 : vector<5x32xf32>
    %227 = vector.extract_strided_slice %212 {offsets = [0, 64], sizes = [5, 32], strides = [1, 1]} : vector<5x160xf32> to vector<5x32xf32>
    %c2_125 = arith.constant 2 : index
    %c0_126 = arith.constant 0 : index
    %c0_127 = arith.constant 0 : index
    %228 = vector.load %arg22[%c2_125, %c0_126, %c0_127] : memref<5x5x5xf32, #tpu.memory_space<vmem>>, vector<1x5x5xf32>
    %229 = vector.shape_cast %228 : vector<1x5x5xf32> to vector<5x5xf32>
    %230 = arith.truncf %229 : vector<5x5xf32> to vector<5x5xbf16>
    %231 = arith.truncf %227 : vector<5x32xf32> to vector<5x32xbf16>
    %cst_128 = arith.constant dense<0.000000e+00> : vector<5x32xf32>
    %232 = tpu.matmul %230, %231, %cst_128 {dimension_numbers = #tpu.dot_dimension_numbers<[1], [0], [0], [1], [0, 0, 1, 1], [], []>} : vector<5x5xbf16>, vector<5x32xbf16>, vector<5x32xf32> -> vector<5x32xf32>
    %233 = arith.addf %226, %232 : vector<5x32xf32>
    %234 = vector.extract_strided_slice %212 {offsets = [0, 96], sizes = [5, 32], strides = [1, 1]} : vector<5x160xf32> to vector<5x32xf32>
    %c3_129 = arith.constant 3 : index
    %c0_130 = arith.constant 0 : index
    %c0_131 = arith.constant 0 : index
    %235 = vector.load %arg22[%c3_129, %c0_130, %c0_131] : memref<5x5x5xf32, #tpu.memory_space<vmem>>, vector<1x5x5xf32>
    %236 = vector.shape_cast %235 : vector<1x5x5xf32> to vector<5x5xf32>
    %237 = arith.truncf %236 : vector<5x5xf32> to vector<5x5xbf16>
    %238 = arith.truncf %234 : vector<5x32xf32> to vector<5x32xbf16>
    %cst_132 = arith.constant dense<0.000000e+00> : vector<5x32xf32>
    %239 = tpu.matmul %237, %238, %cst_132 {dimension_numbers = #tpu.dot_dimension_numbers<[1], [0], [0], [1], [0, 0, 1, 1], [], []>} : vector<5x5xbf16>, vector<5x32xbf16>, vector<5x32xf32> -> vector<5x32xf32>
    %240 = arith.addf %233, %239 : vector<5x32xf32>
    %241 = vector.extract_strided_slice %212 {offsets = [0, 128], sizes = [5, 32], strides = [1, 1]} : vector<5x160xf32> to vector<5x32xf32>
    %c4_133 = arith.constant 4 : index
    %c0_134 = arith.constant 0 : index
    %c0_135 = arith.constant 0 : index
    %242 = vector.load %arg22[%c4_133, %c0_134, %c0_135] : memref<5x5x5xf32, #tpu.memory_space<vmem>>, vector<1x5x5xf32>
    %243 = vector.shape_cast %242 : vector<1x5x5xf32> to vector<5x5xf32>
    %244 = arith.truncf %243 : vector<5x5xf32> to vector<5x5xbf16>
    %245 = arith.truncf %241 : vector<5x32xf32> to vector<5x32xbf16>
    %cst_136 = arith.constant dense<0.000000e+00> : vector<5x32xf32>
    %246 = tpu.matmul %244, %245, %cst_136 {dimension_numbers = #tpu.dot_dimension_numbers<[1], [0], [0], [1], [0, 0, 1, 1], [], []>} : vector<5x5xbf16>, vector<5x32xbf16>, vector<5x32xf32> -> vector<5x32xf32>
    %247 = arith.addf %240, %246 : vector<5x32xf32>
    %c0_137 = arith.constant 0 : index
    %c0_138 = arith.constant 0 : index
    %248 = vector.load %arg15[%c0_137, %c0_138] : memref<32x96xbf16, #tpu.memory_space<vmem>>, vector<32x96xbf16>
    %249 = arith.truncf %247 : vector<5x32xf32> to vector<5x32xbf16>
    %cst_139 = arith.constant dense<0.000000e+00> : vector<5x96xf32>
    %250 = tpu.matmul %249, %248, %cst_139 {dimension_numbers = #tpu.dot_dimension_numbers<[1], [0], [0], [1], [0, 0, 1, 1], [], []>} : vector<5x32xbf16>, vector<32x96xbf16>, vector<5x96xf32> -> vector<5x96xf32>
    %c0_140 = arith.constant 0 : index
    %c0_141 = arith.constant 0 : index
    %251 = vector.load %arg17[%c0_140, %c0_141] : memref<1x96xf32, #tpu.memory_space<vmem>>, vector<1x96xf32>
    %252 = vector.broadcast %251 : vector<1x96xf32> to vector<5x96xf32>
    %253 = arith.addf %250, %252 : vector<5x96xf32>
    %c0_142 = arith.constant 0 : index
    %c0_143 = arith.constant 0 : index
    %254 = vector.load %arg16[%c0_142, %c0_143] : memref<32x96xbf16, #tpu.memory_space<vmem>>, vector<32x96xbf16>
    %cst_144 = arith.constant dense<0.000000e+00> : vector<5x96xf32>
    %255 = tpu.matmul %207, %254, %cst_144 {dimension_numbers = #tpu.dot_dimension_numbers<[1], [0], [0], [1], [0, 0, 1, 1], [], []>} : vector<5x32xbf16>, vector<32x96xbf16>, vector<5x96xf32> -> vector<5x96xf32>
    %256 = vector.extract_strided_slice %253 {offsets = [0, 0], sizes = [5, 32], strides = [1, 1]} : vector<5x96xf32> to vector<5x32xf32>
    %257 = vector.extract_strided_slice %255 {offsets = [0, 0], sizes = [5, 32], strides = [1, 1]} : vector<5x96xf32> to vector<5x32xf32>
    %258 = arith.addf %256, %257 : vector<5x32xf32>
    %259 = arith.negf %258 : vector<5x32xf32>
    %260 = math.exp %259 : vector<5x32xf32>
    %cst_145 = arith.constant 1.000000e+00 : f32
    %261 = vector.broadcast %cst_145 : f32 to vector<5x32xf32>
    %262 = arith.addf %261, %260 : vector<5x32xf32>
    %263 = arith.divf %261, %262 : vector<5x32xf32>
    %264 = vector.extract_strided_slice %253 {offsets = [0, 32], sizes = [5, 32], strides = [1, 1]} : vector<5x96xf32> to vector<5x32xf32>
    %265 = vector.extract_strided_slice %255 {offsets = [0, 32], sizes = [5, 32], strides = [1, 1]} : vector<5x96xf32> to vector<5x32xf32>
    %266 = arith.addf %264, %265 : vector<5x32xf32>
    %267 = arith.negf %266 : vector<5x32xf32>
    %268 = math.exp %267 : vector<5x32xf32>
    %cst_146 = arith.constant 1.000000e+00 : f32
    %269 = vector.broadcast %cst_146 : f32 to vector<5x32xf32>
    %270 = arith.addf %269, %268 : vector<5x32xf32>
    %271 = arith.divf %269, %270 : vector<5x32xf32>
    %272 = vector.extract_strided_slice %253 {offsets = [0, 64], sizes = [5, 32], strides = [1, 1]} : vector<5x96xf32> to vector<5x32xf32>
    %273 = vector.extract_strided_slice %255 {offsets = [0, 64], sizes = [5, 32], strides = [1, 1]} : vector<5x96xf32> to vector<5x32xf32>
    %274 = arith.mulf %271, %273 : vector<5x32xf32>
    %275 = arith.addf %272, %274 : vector<5x32xf32>
    %276 = math.tanh %275 : vector<5x32xf32>
    %cst_147 = arith.constant 1.000000e+00 : f32
    %277 = vector.broadcast %cst_147 : f32 to vector<5x32xf32>
    %278 = arith.subf %277, %263 : vector<5x32xf32>
    %279 = arith.mulf %278, %206 : vector<5x32xf32>
    %280 = arith.mulf %263, %276 : vector<5x32xf32>
    %281 = arith.addf %279, %280 : vector<5x32xf32>
    %c0_148 = arith.constant 0 : index
    %c0_149 = arith.constant 0 : index
    %282 = vector.load %arg10[%c0_148, %c0_149] : memref<1x5xbf16, #tpu.memory_space<vmem>>, vector<1x5xbf16>
    %283 = arith.truncf %281 : vector<5x32xf32> to vector<5x32xbf16>
    %cst_150 = arith.constant dense<0.000000e+00> : vector<1x32xf32>
    %284 = tpu.matmul %282, %283, %cst_150 {dimension_numbers = #tpu.dot_dimension_numbers<[1], [0], [0], [1], [0, 0, 1, 1], [], []>} : vector<1x5xbf16>, vector<5x32xbf16>, vector<1x32xf32> -> vector<1x32xf32>
    %cst_151 = arith.constant 2.000000e-01 : f32
    %285 = vector.broadcast %cst_151 : f32 to vector<1x32xf32>
    %286 = arith.mulf %284, %285 : vector<1x32xf32>
    %c0_152 = arith.constant 0 : index
    %c0_153 = arith.constant 0 : index
    %287 = vector.load %arg18[%c0_152, %c0_153] : memref<32x5xbf16, #tpu.memory_space<vmem>>, vector<32x5xbf16>
    %288 = arith.truncf %286 : vector<1x32xf32> to vector<1x32xbf16>
    %cst_154 = arith.constant dense<0.000000e+00> : vector<1x5xf32>
    %289 = tpu.matmul %288, %287, %cst_154 {dimension_numbers = #tpu.dot_dimension_numbers<[1], [0], [0], [1], [0, 0, 1, 1], [], []>} : vector<1x32xbf16>, vector<32x5xbf16>, vector<1x5xf32> -> vector<1x5xf32>
    %c0_155 = arith.constant 0 : index
    %c0_156 = arith.constant 0 : index
    %c0_157 = arith.constant 0 : index
    %290 = vector.load %arg4[%c0_155, %c0_156, %c0_157] : memref<1x1x32xf32, #tpu.memory_space<vmem>>, vector<1x1x32xf32>
    %291 = vector.shape_cast %290 : vector<1x1x32xf32> to vector<1x32xf32>
    %c0_158 = arith.constant 0 : index
    %c0_159 = arith.constant 0 : index
    %292 = vector.load %arg19[%c0_158, %c0_159] : memref<32x5xbf16, #tpu.memory_space<vmem>>, vector<32x5xbf16>
    %293 = arith.truncf %291 : vector<1x32xf32> to vector<1x32xbf16>
    %cst_160 = arith.constant dense<0.000000e+00> : vector<1x5xf32>
    %294 = tpu.matmul %293, %292, %cst_160 {dimension_numbers = #tpu.dot_dimension_numbers<[1], [0], [0], [1], [0, 0, 1, 1], [], []>} : vector<1x32xbf16>, vector<32x5xbf16>, vector<1x5xf32> -> vector<1x5xf32>
    %295 = arith.addf %289, %294 : vector<1x5xf32>
    %c0_161 = arith.constant 0 : index
    %c0_162 = arith.constant 0 : index
    %296 = vector.load %arg20[%c0_161, %c0_162] : memref<1x5xf32, #tpu.memory_space<vmem>>, vector<1x5xf32>
    %297 = arith.addf %295, %296 : vector<1x5xf32>
    %c0_163 = arith.constant 0 : index
    %c0_164 = arith.constant 0 : index
    %c0_165 = arith.constant 0 : index
    %298 = vector.load %arg21[%c0_163, %c0_164, %c0_165] : memref<1x1x5xf32, #tpu.memory_space<vmem>>, vector<1x1x5xf32>
    %299 = vector.shape_cast %298 : vector<1x1x5xf32> to vector<1x5xf32>
    %300 = vector.shape_cast %297 : vector<1x5xf32> to vector<1x1x5xf32>
    tpu.vector_store %arg21[%c0_163, %c0_164, %c0_165], %300 {strides = array<i32>} : memref<1x1x5xf32, #tpu.memory_space<vmem>>, vector<1x1x5xf32>,
    return
  }
  func.func @transform_0(%arg0: i32) -> (i32, i32, i32) {
    %c0_i32 = arith.constant 0 : i32
    %c0_i32_0 = arith.constant 0 : i32
    %c0_i32_1 = arith.constant 0 : i32
    return %arg0, %c0_i32, %c0_i32_0 : i32, i32, i32
  }
  func.func @transform_1(%arg0: i32) -> (i32, i32, i32) {
    %c0_i32 = arith.constant 0 : i32
    %c0_i32_0 = arith.constant 0 : i32
    %c0_i32_1 = arith.constant 0 : i32
    return %arg0, %c0_i32, %c0_i32_0 : i32, i32, i32
  }
  func.func @transform_2(%arg0: i32) -> (i32, i32, i32) {
    %c0_i32 = arith.constant 0 : i32
    %c0_i32_0 = arith.constant 0 : i32
    %c0_i32_1 = arith.constant 0 : i32
    return %arg0, %c0_i32, %c0_i32_0 : i32, i32, i32
  }
  func.func @transform_3(%arg0: i32) -> (i32, i32, i32) {
    %c0_i32 = arith.constant 0 : i32
    %c0_i32_0 = arith.constant 0 : i32
    %c0_i32_1 = arith.constant 0 : i32
    return %arg0, %c0_i32, %c0_i32_0 : i32, i32, i32
  }
  func.func @transform_4(%arg0: i32) -> (i32, i32, i32) {
    %c0_i32 = arith.constant 0 : i32
    %c0_i32_0 = arith.constant 0 : i32
    %c0_i32_1 = arith.constant 0 : i32
    return %arg0, %c0_i32, %c0_i32_0 : i32, i32, i32
  }
  func.func @transform_5(%arg0: i32) -> (i32, i32) {
    %c0_i32 = arith.constant 0 : i32
    %c0_i32_0 = arith.constant 0 : i32
    %c0_i32_1 = arith.constant 0 : i32
    return %c0_i32, %c0_i32_0 : i32, i32
  }
  func.func @transform_6(%arg0: i32) -> (i32, i32) {
    %c0_i32 = arith.constant 0 : i32
    %c0_i32_0 = arith.constant 0 : i32
    %c0_i32_1 = arith.constant 0 : i32
    return %c0_i32, %c0_i32_0 : i32, i32
  }
  func.func @transform_7(%arg0: i32) -> (i32, i32) {
    %c0_i32 = arith.constant 0 : i32
    %c0_i32_0 = arith.constant 0 : i32
    %c0_i32_1 = arith.constant 0 : i32
    return %c0_i32, %c0_i32_0 : i32, i32
  }
  func.func @transform_8(%arg0: i32) -> (i32, i32) {
    %c0_i32 = arith.constant 0 : i32
    %c0_i32_0 = arith.constant 0 : i32
    %c0_i32_1 = arith.constant 0 : i32
    return %c0_i32, %c0_i32_0 : i32, i32
  }
  func.func @transform_9(%arg0: i32) -> (i32, i32) {
    %c0_i32 = arith.constant 0 : i32
    %c0_i32_0 = arith.constant 0 : i32
    %c0_i32_1 = arith.constant 0 : i32
    return %c0_i32, %c0_i32_0 : i32, i32
  }
  func.func @transform_10(%arg0: i32) -> (i32, i32) {
    %c0_i32 = arith.constant 0 : i32
    %c0_i32_0 = arith.constant 0 : i32
    %c0_i32_1 = arith.constant 0 : i32
    return %c0_i32, %c0_i32_0 : i32, i32
  }
  func.func @transform_11(%arg0: i32) -> (i32, i32) {
    %c0_i32 = arith.constant 0 : i32
    %c0_i32_0 = arith.constant 0 : i32
    %c0_i32_1 = arith.constant 0 : i32
    return %c0_i32, %c0_i32_0 : i32, i32
  }
  func.func @transform_12(%arg0: i32) -> (i32, i32) {
    %c0_i32 = arith.constant 0 : i32
    %c0_i32_0 = arith.constant 0 : i32
    %c0_i32_1 = arith.constant 0 : i32
    return %c0_i32, %c0_i32_0 : i32, i32
  }
  func.func @transform_13(%arg0: i32) -> (i32, i32) {
    %c0_i32 = arith.constant 0 : i32
    %c0_i32_0 = arith.constant 0 : i32
    %c0_i32_1 = arith.constant 0 : i32
    return %c0_i32, %c0_i32_0 : i32, i32
  }
  func.func @transform_14(%arg0: i32) -> (i32, i32) {
    %c0_i32 = arith.constant 0 : i32
    %c0_i32_0 = arith.constant 0 : i32
    %c0_i32_1 = arith.constant 0 : i32
    return %c0_i32, %c0_i32_0 : i32, i32
  }
  func.func @transform_15(%arg0: i32) -> (i32, i32) {
    %c0_i32 = arith.constant 0 : i32
    %c0_i32_0 = arith.constant 0 : i32
    %c0_i32_1 = arith.constant 0 : i32
    return %c0_i32, %c0_i32_0 : i32, i32
  }
  func.func @transform_16(%arg0: i32) -> (i32, i32) {
    %c0_i32 = arith.constant 0 : i32
    %c0_i32_0 = arith.constant 0 : i32
    %c0_i32_1 = arith.constant 0 : i32
    return %c0_i32, %c0_i32_0 : i32, i32
  }
  func.func @transform_17(%arg0: i32) -> (i32, i32) {
    %c0_i32 = arith.constant 0 : i32
    %c0_i32_0 = arith.constant 0 : i32
    %c0_i32_1 = arith.constant 0 : i32
    return %c0_i32, %c0_i32_0 : i32, i32
  }
  func.func @transform_18(%arg0: i32) -> (i32, i32) {
    %c0_i32 = arith.constant 0 : i32
    %c0_i32_0 = arith.constant 0 : i32
    %c0_i32_1 = arith.constant 0 : i32
    return %c0_i32, %c0_i32_0 : i32, i32
  }
  func.func @transform_19(%arg0: i32) -> (i32, i32) {
    %c0_i32 = arith.constant 0 : i32
    %c0_i32_0 = arith.constant 0 : i32
    %c0_i32_1 = arith.constant 0 : i32
    return %c0_i32, %c0_i32_0 : i32, i32
  }
  func.func @transform_20(%arg0: i32) -> (i32, i32, i32) {
    %c0_i32 = arith.constant 0 : i32
    %c0_i32_0 = arith.constant 0 : i32
    %c0_i32_1 = arith.constant 0 : i32
    return %arg0, %c0_i32, %c0_i32_0 : i32, i32, i32
  }
}

</mosaic_0001>

<bundles_post_ra>
// kernel: tpu_custom_call.1
= control target key start
LH: loop header
LB: loop body
LE: loop exit
PB: predicated region body
PF: predicated region fallthrough
CT: control target
= control target key end

     0   :  { %s2649_s0 = inlined_call_operand.vmem [shape: f32[2,5,32], index: 0, kind: input, shape index: {}]   ;;  %s2650_s1 = inlined_call_operand.vmem [shape: f32[2,25,32], index: 1, kind: input, shape index: {}]   ;;  %s2651_s2 = inlined_call_operand.vmem [shape: f32[2,1,32], index: 2, kind: input, shape index: {}]   ;;  %s2652_s3 = inlined_call_operand.vmem [shape: f32[2,1,32], index: 3, kind: input, shape index: {}]   ;;  %s2653_s4 = inlined_call_operand.vmem [shape: f32[2,25,1], index: 4, kind: input, shape index: {}]   ;;  %s2654_s5 = inlined_call_operand.vmem [shape: bf16[25,25], index: 5, kind: input, shape index: {}]   ;;  %s2655_s6 = inlined_call_operand.vmem [shape: bf16[5,25], index: 6, kind: input, shape index: {}]   ;;  %s2656_s7 = inlined_call_operand.vmem [shape: bf16[5,25], index: 7, kind: input, shape index: {}]   ;;  %s2657_s8 = inlined_call_operand.vmem [shape: bf16[5,1], index: 8, kind: input, shape index: {}]   ;;  %s2658_s9 = inlined_call_operand.vmem [shape: bf16[1,5], index: 9, kind: input, shape index: {}]   ;;  %s2659_s10 = inlined_call_operand.vmem [shape: bf16[32,5], index: 10, kind: input, shape index: {}]   ;;  %s2660_s11 = inlined_call_operand.vmem [shape: bf16[32,32], index: 11, kind: input, shape index: {}]   ;;  %s2661_s12 = inlined_call_operand.vmem [shape: bf16[32,160], index: 12, kind: input, shape index: {}]   ;;  %s2662_s13 = inlined_call_operand.vmem [shape: f32[1,160], index: 13, kind: input, shape index: {}]   ;;  %s2663_s14 = inlined_call_operand.vmem [shape: bf16[32,96], index: 14, kind: input, shape index: {}]   ;;  %s2664_s15 = inlined_call_operand.vmem [shape: bf16[32,96], index: 15, kind: input, shape index: {}]   ;;  %s2665_s16 = inlined_call_operand.vmem [shape: f32[1,96], index: 16, kind: input, shape index: {}]   ;;  %s2666_s17 = inlined_call_operand.vmem [shape: bf16[32,5], index: 17, kind: input, shape index: {}]   ;;  %s2667_s18 = inlined_call_operand.vmem [shape: bf16[32,5], index: 18, kind: input, shape index: {}]   ;;  %s2668_s19 = inlined_call_operand.vmem [shape: f32[1,5], index: 19, kind: input, shape index: {}]   ;;  %s2669_s20 = inlined_call_operand.hbm [shape: f32[2,1,5], index: 20, kind: output, shape index: {}]  }
   0x1   :  { %2674 = sst [smem:[#allocation10_spill]] %s2649_s0 }
   0x2   :  { %2675 = sst [smem:[#allocation11_spill]] %s2650_s1 }
   0x3   :  { %2676 = sst [smem:[#allocation12_spill]] %s2651_s2 }
   0x4   :  { %2677 = sst [smem:[#allocation13_spill]] %s2652_s3 }
   0x5   :  { %2678 = sst [smem:[#allocation14_spill]] %s2653_s4 }
   0x6   :  { %2679 = sst [smem:[#allocation15_spill]] %s2656_s7 }
   0x7   :  { %2680 = sst [smem:[#allocation16_spill]] %s2659_s10 }
   0x8   :  { %25 = vsyncpa [#allocation4], 0 }
   0x9   :  { %27 = vsyncpa [#allocation4 + $0x1], 0  ;;  %s2253_s1 = smov 0   ;;  %s2255_s22 = smov 0  }
   0xa   :  { %s2257_s23 = smov 0   ;;  %s2259_s24 = smov 0  }
   0xb LB: > { %2681 = sst [smem:[#allocation6_spill]] %s2133_s23  ;;  %s2274_s2 = sadd.s32 4294967295, %s2137_s24   ;;  %s2137_s24 = sphi %s2259_s24, %s2695_s24   ;;  %s2133_s23 = sphi %s2257_s23, %s2697_s23   ;;  %s2129_s22 = sphi %s2255_s22, %s2699_s22   ;;  %s2125_s1 = sphi %s2253_s1, %s2698_s1  }
   0xc   : > { %s1852_s25 = sadd.s32 4294967294, %s2137_s24   ;;  %s2278_s3 = sadd.s32 1, %s2137_s24  }
   0xd   : > { %2682 = sst [smem:[#allocation7_spill]] %s2278_s3  ;;  %s485_s26 = sadd.s32 1, %s2133_s23 }
   0xe   : > { %s482_s27 = ssub.s32 %s2137_s24, %s2278_s3  ;;  %p495_p0 = scmp.ne.s32.totalorder %s2133_s23, %s2129_s22 }
   0xf   : > { %p483_p1 = scmp.eq.s32.totalorder %s482_s27, 0  ;;  %p496_p2 = scmp.eq.s32.totalorder %s2274_s2, 1 }
  0x10   : > { %p501_p3 = scmp.ne.s32.totalorder %s2129_s22, %s2125_s1  ;;  %p502_p4 = scmp.eq.s32.totalorder %s1852_s25, 1 }
  0x11   : > { %s2289_s28 = scalar_select %p483_p1, %s2133_s23, %s485_s26  }
  0x12   : > { %p2291_p5 = por %p496_p2, %p495_p0  ;;  %p2295_p6 = por %p502_p4, %p501_p3 }
  0x13   : > { %2683 = sst [smem:[#allocation8_spill]] %s2289_s28  ;;  %p1855_p7 = scmp.ge.s32.totalorder %s2137_s24, 1 }
  0x14   : > { %s2685_s29 = scalar_select %p2295_p6, 1, 0 }
  0x15   : > { %p600_p8 = scmp.lt.s32.totalorder %s2137_s24, 3 }
  0x16   : > { %2686 = sst [smem:[#allocation9_spill]] %s2685_s29 }
  0x17   : > { %p601_p9 = pnand %p1855_p7, %p600_p8 }
  0x18   : > { %s2687_s10 = sld [smem:[#allocation16_spill]] (!%p601_p9)  ;;  %p672_p10 = scmp.lt.s32.totalorder (!%p601_p9), %s2274_s2, 1 }
  0x19   : > { %604 = sbr.rel (%p601_p9) target bundleno = 3209 (0xc89), region = 100  ;;  %s2688_s3 = sld [smem:[#allocation11_spill]] (!%p601_p9) }
  0x1a   : > { %s2689_s28 = sld [smem:[#allocation14_spill]] (!%p601_p9)  ;;  %s2143_s21 = smov (!%p601_p9), 123  }
  0x1b   : > { %s2690_s7 = sld [smem:[#allocation15_spill]] (!%p601_p9)  ;;  %s2144_s25 = smov (!%p601_p9), 108  }
  0x1c   : > { %s2692_s0 = sld [smem:[#allocation10_spill]] (!%p601_p9)  ;;  %s2146_s23 = smov (!%p601_p9), 64  }
  0x1e   : > { %v1970_v0 = vld [vmem:[%s2687_s10 + $0x8] sm:$0xff]  ;;  %v1969_v1 = vld [vmem:[%s2687_s10] sm:$0xff]  ;;  %s2309_s26 = scalar_select %p672_p10, %s2274_s2, 1  ;;  %vm715_vm0 = vcmask 261120   ;;  %vm741_vm1 = vcmask 39936   ;;  %vm751_vm2 = vcmask 32768  }
  0x1f   : > { %728 = vmatpush.bf16.msra.mxu0 %v1970_v0  ;;  %v2139_v18 = vmov 0   ;;  %vm824_vm3 = vcmask 1041408   ;;  %vm825_vm4 = vcmask 1042432   ;;  %v2140_v41 = vmov 65535  }
  0x20   : > { %s1967_s27 = sshll.u32 %s2309_s26, 5  ;;  %2038 = vset.pattern.permute.xlu1 %v2139_v18  ;;  %2037 = vset.pattern.permute.xlu0 %v2139_v18  ;;  %v826_v42 = vsel %vm824_vm3, 4294967295, %v2140_v41  ;;  %vm877_vm5 = vcmask 1043456   ;;  %vm878_vm6 = vcmask 1044480   ;;  %vm873_vm7 = vcmask 203776  }
  0x21   : > { %s680_s29 = scalar_lea.vmem %s2688_s3, %s1967_s27  ;;  %2039 = vset.pattern.permute.xlu2 %v2139_v18  ;;  %v815_v43 = vld [vmem:[%s2690_s7] sm:$0x7]  ;;  %v2341_v44 = vsel %vm825_vm4, %v826_v42, 0  ;;  %s2691_s3 = sld [smem:[#allocation12_spill]]  ;;  %vm960_vm8 = vcmask 1040384   ;;  %vm956_vm9 = vcmask 7168  }
  0x22   : > { %v693_v2 = vld [vmem:[%s680_s29] sm:$0xff]  ;;  %v694_v3 = vld [vmem:[%s680_s29 + $0x8] sm:$0xff]  ;;  %v695_v5 = vld [vmem:[%s680_s29 + $0x10] sm:$0xff]  ;;  %v829_v45 = vand.u32 %v2341_v44, %v815_v43  ;;  %vm897_vm10 = vcmask 36864   ;;  %s2693_s7 = sld [smem:[#allocation13_spill]] }
  0x23   : > { %729 = vmatpush.bf16.msra.mxu0 %v1969_v1  ;;  %v701_v4 = vpack.c.bf16 %v694_v3, %v693_v2  ;;  %v696_v6 = vld [vmem:[%s680_s29 + $0x18] sm:$0x1]  ;;  %s2324_s29 = scalar_lea.vmem %s2689_s28, %s1967_s27  ;;  %s1856_s27 = sshll.u32 %s2309_s26, 3 }
  0x24   : > { %v702_v7 = vpack.c.bf16 %v696_v6, %v695_v5  ;;  %v787_v16 = vld [vmem:[%s2324_s29] sm:$0xff]  ;;  %v788_v17 = vld [vmem:[%s2324_s29 + $0x8] sm:$0xff]  ;;  %v790_v19 = vld [vmem:[%s2324_s29 + $0x18] sm:$0x1]  ;;  %838 = vmatpush.bf16.msra.mxu1 %v829_v45  ;;  %s675_s10 = scalar_lea.vmem %s2692_s0, %s1856_s27  ;;  %s2142_s0 = smov 118  }
  0x25   : > { %v789_v40 = vld [vmem:[%s2324_s29 + $0x10] sm:$0xff]  ;;  %v1971_v5 = vld [vmem:[%s2660_s11] sm:$0xff]  ;;  %s2141_s29 = smov 96   ;;  %s2145_s27 = smov 113  }
  0x26   : > { %1869 = vmatmul.msk.bf16.vlgmr.msra.gmra.mxu0 %vm715_vm0, %v701_v4  ;;  %v1972_v4 = vld [vmem:[%s2660_s11 + $0x8] sm:$0xff] }
  0x27   : > { %947 = vmatpush.bf16.msra.mxu3 %v1972_v4  ;;  %s683_s28 = scalar_lea.vmem %s2691_s3, %s2309_s26  ;;  %s2147_s3 = smov 32  }
  0x28   : > { %v920_v6 = vld [vmem:[%s683_s28] sm:$0x1] }
  0x2b   : > { %948 = vmatpush.bf16.msra.mxu3 %v1971_v5 }
  0x36   : > { %1870 = vmatmul.msk.bf16.gmra.mxu0 %vm715_vm0, %v702_v7  ;;  %v925_v7 = vpack.c.bf16 %v920_v6, %v920_v6 }
  0x38   : > { %1882 = vmatmul.msk.bf16.vlgmr.msra.gmra.mxu3 %vm715_vm0, %v925_v7 }
  0xa3   : > { %v731_v8 = vpop.f32.mrf.mxu0 }
  0xa4   : > { %v742_v9 = vsel %vm741_vm1, %v731_v8, -inf }
  0xa5   : > { %743 = vmax.xlane.f32.xlu0 %v742_v9  ;;  %v1976_v9 = vld [vmem:[%s2661_s12 + $0x14] sm:$0xf0] }
  0xab   : > { %v733_v10 = vpop.f32.mrf.mxu0 }
  0xac   : > { %v745_v11 = vsel %vm741_vm1, %v733_v10, -inf }
  0xad   : > { %746 = vmax.xlane.f32.xlu0 %v745_v11  ;;  %v1886_v11 = vld [vmem:[%s2661_s12] sm:$0xf] }
  0xb3   : > { %v736_v12 = vpop.f32.mrf.mxu0 }
  0xb4   : > { %v748_v13 = vsel %vm741_vm1, %v736_v12, -inf }
  0xb5   : > { %749 = vmax.xlane.f32.xlu1 %v748_v13 }
  0xbb   : > { %v738_v14 = vpop.f32.mrf.mxu0 }
  0xbc   : > { %v752_v15 = vsel %vm751_vm2, %v738_v14, -inf }
  0xbd   : > { %753 = vmax.xlane.f32.xlu1 %v752_v15 }
  0xc1   : > { %793 = vperm.xlu0 %2037, %v787_v16  }
  0xd6   : > { %798 = vperm.xlu1 %2038, %v788_v17  }
  0xde   : > { %808 = vperm.xlu1 %2038, %v790_v19   ;;  %v1975_v19 = vld [vmem:[%s2661_s12 + $0x14] sm:$0xf] }
 0x118   : > { %v744_v20 = vpop.xlane.xlu0 %743 }
 0x119   : > { %v755_v21 = vsub.f32 %v731_v8, %v744_v20  ;;  %v1894_v8 = vld [vmem:[%s2661_s12 + $0x10] sm:$0xf]  ;;  %v1896_v20 = vld [vmem:[%s2661_s12 + $0x18] sm:$0xf0] }
 0x11b   : > { %v759_v22 = vmul.f32 1.442695, %v755_v21  ;;  %v1973_v21 = vld [vmem:[%s2661_s12 + $0x4] sm:$0xf] }
 0x11d   : > { %2041 = vpow2.f32 %v759_v22  ;;  %v2396_v22 = vor.u32 %v1975_v19, %v1896_v20 }
 0x11f   : > { %1033 = vmatpush.bf16.msrb.mxu1 %v2396_v22 }
 0x120   : > { %v747_v23 = vpop.xlane.xlu0 %746 }
 0x121   : > { %v756_v24 = vsub.f32 %v733_v10, %v747_v23  ;;  %v2363_v10 = vor.u32 %v1976_v9, %v1894_v8  ;;  %v1888_v23 = vld [vmem:[%s2661_s12 + $0x8] sm:$0xf0] }
 0x123   : > { %v2042_v25 = vpop.eup %2041  ;;  %v761_v26 = vmul.f32 1.442695, %v756_v24  ;;  %1020 = vmatpush.bf16.msrb.mxu3 %v2363_v10  ;;  %v2402_v24 = vor.u32 %v1973_v21, %v1888_v23 }
 0x124   : > { %v767_v27 = vsel %vm741_vm1, %v2042_v25, 0.0 }
 0x125   : > { %2043 = vpow2.f32 %v761_v26  ;;  %768 = vadd.xlane.f32.xlu2 %v767_v27  ;;  %1034 = vmatpush.bf16.msrb.mxu1 %v2402_v24  ;;  %v856_v27 = vld [vmem:[%s2654_s5 + $0x8] sm:$0xf] }
 0x128   : > { %v750_v28 = vpop.xlane.xlu1 %749 }
 0x129   : > { %v757_v29 = vsub.f32 %v736_v12, %v750_v28  ;;  %v1974_v12 = vld [vmem:[%s2661_s12 + $0x4] sm:$0xf0]  ;;  %v857_v28 = vld [vmem:[%s2654_s5 + $0xc] sm:$0x1] }
 0x12a   : > { %v2376_v13 = vor.u32 %v1974_v12, %v1886_v11 }
 0x12b   : > { %v2044_v30 = vpop.eup %2043  ;;  %v763_v31 = vmul.f32 1.442695, %v757_v29  ;;  %v864_v29 = vunpack.c.l.bf16 %v856_v27 }
 0x12c   : > { %v770_v32 = vsel %vm741_vm1, %v2044_v30, 0.0  ;;  %1021 = vmatpush.bf16.msrb.mxu3 %v2376_v13 }
 0x12d   : > { %2045 = vpow2.f32 %v763_v31  ;;  %771 = vadd.xlane.f32.xlu2 %v770_v32 }
 0x130   : > { %v754_v33 = vpop.xlane.xlu1 %753 }
 0x131   : > { %v758_v34 = vsub.f32 %v738_v14, %v754_v33  ;;  %v2379_v14 = vld [vmem:[%s675_s10] sm:$0x1f] }
 0x132   : > { %v2383_v15 = vpack.c.bf16 %v2379_v14, %v2379_v14 }
 0x133   : > { %v2046_v35 = vpop.eup %2045  ;;  %v765_v36 = vmul.f32 1.442695, %v758_v34  ;;  %v794_v51 = vpop.permute.xlu0 %793  ;;  %v865_v34 = vunpack.c.l.bf16 %v857_v28 }
 0x134   : > { %v773_v37 = vsel %vm741_vm1, %v2046_v35, 0.0  ;;  %1900 = vmatmul.msk.bf16.vlgmr.msrb.gmra.mxu3 %vm715_vm0, %v2383_v15 }
 0x135   : > { %2047 = vpow2.f32 %v765_v36  ;;  %774 = vadd.xlane.f32.xlu2 %v773_v37  ;;  %v879_v37 = vsel %vm877_vm5, 4294967295, %v2140_v41  ;;  %v872_v41 = vld [vmem:[%s2655_s6] sm:$0x7] }
 0x136   : > { %v880_v45 = vsel %vm878_vm6, %v879_v37, 0 }
 0x13b   : > { %v2048_v38 = vpop.eup %2047 }
 0x13c   : > { %v776_v39 = vsel %vm751_vm2, %v2048_v38, 0.0 }
 0x13d   : > { %777 = vadd.xlane.f32.xlu2 %v776_v39 }
 0x148   : > { %v799_v54 = vpop.permute.xlu1 %798 }
 0x150   : > { %v809_v0 = vpop.permute.xlu1 %808 }
 0x155   : > { %803 = vperm.xlu2 %2039, %v789_v40  }
 0x198   : > { %v769_v46 = vpop.xlane.xlu2 %768 }
 0x199   : > { %2049 = vrcp.f32 %v769_v46 }
 0x19f   : > { %v2050_v48 = vpop.eup %2049 }
 0x1a0   : > { %v772_v47 = vpop.xlane.xlu2 %771  ;;  %v783_v49 = vmul.f32 %v2050_v48, %v2042_v25 }
 0x1a1   : > { %2051 = vrcp.f32 %v772_v47 }
 0x1a2   : > { %v811_v55 = vmul.f32 %v794_v51, %v783_v49 }
 0x1a7   : > { %v2052_v50 = vpop.eup %2051 }
 0x1a8   : > { %v784_v52 = vmul.f32 %v2052_v50, %v2044_v30  ;;  %v775_v53 = vpop.xlane.xlu2 %774 }
 0x1a9   : > { %2053 = vrcp.f32 %v775_v53  ;;  %v950_v53 = vpop.f32.mrf.mxu3 }
 0x1aa   : > { %v812_v56 = vmul.f32 %v799_v54, %v784_v52  ;;  %v962_v54 = vsel %vm960_vm8, 65535, %v2139_v18  ;;  %v954_v18 = vld [vmem:[%s2657_s8] sm:$0x7] }
 0x1ac   : > { %v816_v57 = vpack.c.bf16 %v812_v56, %v811_v55  ;;  %v955_v55 = vpack.c.bf16 %v950_v53, %v950_v53 }
 0x1ae   : > { %1871 = vmatmul.msk.bf16.vlgmr.msra.gmra.mxu1 %vm741_vm1, %v816_v57  ;;  %v964_v56 = vand.u32 %v962_v54, %v955_v55 }
 0x1af   : > { %v2054_v59 = vpop.eup %2053 }
 0x1b0   : > { %v778_v58 = vpop.xlane.xlu2 %777  ;;  %v785_v61 = vmul.f32 %v2054_v59, %v2046_v35 }
 0x1b1   : > { %2055 = vrcp.f32 %v778_v58  ;;  %v952_v57 = vpop.f32.mrf.mxu3  ;;  %v985_v58 = vld [vmem:[%s2662_s13] sm:$0x3] }
 0x1b2   : > { %v2424_v59 = vperm.slane %v985_v58, 0  ;;  %v2440_v7 = vperm.slane %v985_v58, 1 }
 0x1b7   : > { %v2056_v60 = vpop.eup %2055 }
 0x1b8   : > { %v786_v62 = vmul.f32 %v2056_v60, %v2048_v38  ;;  %v804_v63 = vpop.permute.xlu2 %803  ;;  %v1986_v38 = vld [vmem:[%s2654_s5] sm:$0xff]  }
 0x1b9   : > { %v813_v1 = vmul.f32 %v804_v63, %v785_v61  ;;  %v1988_v39 = vunpack.c.h.bf16 %v1986_v38  ;;  %v1987_v46 = vunpack.c.l.bf16 %v1986_v38  ;;  %v1023_v60 = vpop.f32.mrf.mxu3 }
 0x1ba   : > { %v814_v2 = vmul.f32 %v809_v0, %v786_v62  ;;  %v1024_v61 = vadd.f32 %v1023_v60, %v2424_v59 }
 0x1bc   : > { %v817_v3 = vpack.c.bf16 %v814_v2, %v813_v1  ;;  %v1042_v62 = vpack.c.bf16 %v1024_v61, %v1024_v61  ;;  %v2504_v61 = vld [vmem:[%s2665_s16] ss:$0 sm:$0xff] }
 0x1be   : > { %1872 = vmatmul.msk.bf16.gmra.mxu1 %vm741_vm1, %v817_v3  ;;  %1066 = vrot.lane.b32.xlu2 %v1042_v62, %s2141_s29  ;;  %v1047_v0 = vand.u32 %v1042_v62, %v2341_v44 }
 0x1c0   : > { %1056 = vmatpush.bf16.msrb.mxu0 %v1047_v0 }
 0x1c1   : > { %v1025_v63 = vpop.f32.mrf.mxu3 }
 0x1ce   : > { %1901 = vmatmul.msk.bf16.vlgmr.msrb.gmra.mxu1 %vm715_vm0, %v2383_v15 }
 0x218   : > { %v1067_v5 = vpop.permute.xlu2 %1066 }
 0x219   : > { %v1072_v6 = vand.u32 %v1067_v5, %v2341_v44 }
 0x22b   : > { %v840_v16 = vpop.f32.mrf.mxu1 }
 0x22c   : > { %v850_v35 = vpack.c.bf16 %v840_v16, %v840_v16 }
 0x22e   : > { %v858_v47 = vunpack.c.l.bf16 %v850_v35  ;;  %v2472_v35 = vld [vmem:[%s2664_s15] sm:$0xff] }
 0x230   : > { %v866_v51 = vmul.f32 %v1987_v46, %v858_v47  ;;  %v2495_v46 = vld [vmem:[%s2663_s14] sm:$0xff] }
 0x233   : > { %v842_v17 = vpop.f32.mrf.mxu1 }
 0x234   : > { %v851_v31 = vpack.c.bf16 %v842_v17, %v842_v17 }
 0x236   : > { %v859_v40 = vunpack.c.l.bf16 %v851_v31 }
 0x238   : > { %v867_v49 = vmul.f32 %v1988_v39, %v859_v40 }
 0x23a   : > { %v870_v52 = vpack.c.bf16 %v867_v49, %v866_v51 }
 0x23b   : > { %v845_v25 = vpop.f32.mrf.mxu1 }
 0x23c   : > { %v852_v26 = vpack.c.bf16 %v845_v25, %v845_v25 }
 0x23e   : > { %v860_v32 = vunpack.c.l.bf16 %v852_v26 }
 0x240   : > { %v868_v42 = vmul.f32 %v864_v29, %v860_v32  ;;  %v2458_v29 = vld [vmem:[%s2664_s15 + $0x8] sm:$0xff] }
 0x243   : > { %v847_v30 = vpop.f32.mrf.mxu1 }
 0x244   : > { %v853_v33 = vpack.c.bf16 %v847_v30, %v847_v30 }
 0x246   : > { %v861_v36 = vunpack.c.l.bf16 %v853_v33 }
 0x248   : > { %v869_v43 = vmul.f32 %v865_v34, %v861_v36 }
 0x24a   : > { %v871_v48 = vpack.c.bf16 %v869_v43, %v868_v42 }
 0x24b   : > { %v1036_v8 = vpop.f32.mrf.mxu1 }
 0x24c   : > { %v882_v50 = vand.u32 %v880_v45, %v871_v48  ;;  %v1037_v9 = vadd.f32 %v1036_v8, %v2440_v7  ;;  %v2489_v45 = vld [vmem:[%s2663_s14 + $0x8] sm:$0xff] }
 0x24e   : > { %890 = vmatpush.bf16.msra.mxu2 %v882_v50  ;;  %v1138_v11 = vpack.c.bf16 %v1037_v9, %v1037_v9 }
 0x250   : > { %v1143_v12 = vand.u32 %v1138_v11, %v2341_v44 }
 0x252   : > { %891 = vmatpush.bf16.msra.mxu2 %v870_v52  ;;  %1152 = vmatpush.bf16.msra.mxu0 %v1143_v12 }
 0x253   : > { %v1038_v16 = vpop.f32.mrf.mxu1 }
 0x255   : > { %1873 = vmatmul.msk.bf16.vlgmr.msra.gmra.mxu2 %vm873_vm7, %v872_v41 }
 0x256   : > { %973 = vmatpush.bf16.msrb.mxu2 %v964_v56 }
 0x25a   : > { %1081 = vmatpush.bf16.msra.mxu2 %v1072_v6 }
 0x265   : > { %1883 = vmatmul.msk.bf16.vlgmr.msrb.gmra.mxu2 %vm956_vm9, %v954_v18 }
 0x266   : > { %1189 = vmatpush.bf16.msrb.mxu2 %v2489_v45 }
 0x26a   : > { %1190 = vmatpush.bf16.msrb.mxu2 %v2495_v46 }
 0x2d8   : > { %v893_v1 = vpop.f32.mrf.mxu2 }
 0x2d9   : > { %898 = vst.msk [vmem:[#allocation2] sm:$0x1f] %vm897_vm10, %v893_v1  ;;  %905 = vrot.lane.b32.xlu0 %v893_v1, %s2142_s0  ;;  %900 = vrot.lane.b32.xlu1 %v893_v1, %s2143_s21  ;;  %s686_s0 = scalar_lea.vmem %s2693_s7, %s2309_s26  ;;  %s670_s7 = sand.u32 1, %s2129_s22  }
 0x2da   : > { %915 = vrot.lane.b32.xlu2 %v893_v1, %s2144_s25  ;;  %s1751_s25 = scalar_lea.hbm %s2669_s20, %s2274_s2  ;;  %s2095_s21 = scalar_lea.hbm %s2669_s20, 2 }
 0x2db   : > { %s1755_s26 = sshll.u32 %s1751_s25, 4  ;;  %s1756_s26 = int_to_ptr.hbm [resolvable:$true] %s1755_s26 }
 0x2e0   : > { %v895_v2 = vpop.f32.mrf.mxu2  ;;  %v1040_v3 = vld [vmem:[#allocation2] sm:$0x1f] }
 0x2e1   : > { %910 = vrot.lane.b32.xlu0 %v893_v1, %s2145_s27  ;;  %1090 = vrot.lane.b32.xlu1 %v1042_v62, %s2146_s23  ;;  %v2434_v4 = vpack.c.bf16 %v1040_v3, %v1040_v3 }
 0x2e3   : > { %1902 = vmatmul.msk.bf16.vlgmr.msrb.gmra.mxu0 %vm741_vm1, %v2434_v4 }
 0x2e4   : > { %1287 = vmatpush.bf16.msrb.mxu0 %v2396_v22 }
 0x2e8   : > { %1288 = vmatpush.bf16.msrb.mxu0 %v2402_v24  ;;  %v2449_v21 = vpop.f32.mrf.mxu2 }
 0x2e9   : > { %1114 = vrot.lane.b32.xlu1 %v1042_v62, %s2147_s3 }
 0x2f0   : > { %v977_v23 = vpop.f32.mrf.mxu2 }
 0x334   : > { %v916_v17 = vpop.permute.xlu2 %915 }
 0x335   : > { %919 = vst.msk [vmem:[#allocation2 + $0x20] sm:$0x1f] %vm897_vm10, %v916_v17 }
 0x33c   : > { %v1136_v19 = vld [vmem:[#allocation2 + $0x20] sm:$0x1f] }
 0x33d   : > { %v2447_v20 = vpack.c.bf16 %v1136_v19, %v1136_v19 }
 0x33f   : > { %1906 = vmatmul.msk.bf16.vlgmr.msra.gmra.mxu0 %vm741_vm1, %v2447_v20 }
 0x34b   : > { %v906_v25 = vpop.permute.xlu0 %905  ;;  %v901_v26 = vpop.permute.xlu1 %900 }
 0x34c   : > { %909 = vst.msk [vmem:[#allocation2 + $0x10] sm:$0x1f] %vm897_vm10, %v906_v25 }
 0x34d   : > { %904 = vst.msk [vmem:[#allocation2 + $0x8] sm:$0x1f] %vm897_vm10, %v901_v26 }
 0x353   : > { %v911_v27 = vpop.permute.xlu0 %910  ;;  %v1091_v28 = vpop.permute.xlu1 %1090  ;;  %v1088_v32 = vld [vmem:[#allocation2 + $0x10] sm:$0x1f] }
 0x354   : > { %914 = vst.msk [vmem:[#allocation2 + $0x18] sm:$0x1f] %vm897_vm10, %v911_v27  ;;  %v1096_v30 = vand.u32 %v1091_v28, %v2341_v44  ;;  %v1063_v31 = vld [vmem:[#allocation2 + $0x8] sm:$0x1f]  ;;  %v2466_v34 = vpack.c.bf16 %v1088_v32, %v1088_v32 }
 0x355   : > { %v2462_v33 = vpack.c.bf16 %v1063_v31, %v1063_v31 }
 0x356   : > { %1105 = vmatpush.bf16.msra.mxu3 %v1096_v30 }
 0x357   : > { %1903 = vmatmul.msk.bf16.vlgmr.msra.gmra.mxu2 %vm741_vm1, %v2462_v33 }
 0x359   : > { %1904 = vmatmul.msk.bf16.vlgmr.msra.gmra.mxu3 %vm741_vm1, %v2466_v34 }
 0x35a   : > { %1218 = vmatpush.bf16.msrb.mxu3 %v2458_v29 }
 0x35b   : > { %v1115_v36 = vpop.permute.xlu1 %1114  ;;  %v1112_v38 = vld [vmem:[#allocation2 + $0x18] sm:$0x1f] }
 0x35c   : > { %v1120_v37 = vand.u32 %v1115_v36, %v2341_v44  ;;  %v2478_v39 = vpack.c.bf16 %v1112_v38, %v1112_v38 }
 0x35e   : > { %1219 = vmatpush.bf16.msrb.mxu3 %v2472_v35  ;;  %1129 = vmatpush.bf16.msra.mxu1 %v1120_v37 }
 0x360   : > { %v1058_v40 = vpop.f32.mrf.mxu0 }
 0x361   : > { %1905 = vmatmul.msk.bf16.vlgmr.msra.gmra.mxu1 %vm741_vm1, %v2478_v39  ;;  %v1062_v48 = vadd.f32 %v1058_v40, %v2449_v21 }
 0x362   : > { %1274 = vmatpush.bf16.msrb.mxu1 %v2363_v10 }
 0x366   : > { %1275 = vmatpush.bf16.msrb.mxu1 %v2376_v13 }
 0x368   : > { %v1060_v42 = vpop.f32.mrf.mxu0 }
 0x369   : > { %1924 = vmatmul.msk.bf16.vlgmr.msrb.gmra.mxu3 %vm715_vm0, %v2383_v15 }
 0x3bc   : > { %v1154_v43 = vpop.f32.mrf.mxu0 }
 0x3c4   : > { %v1156_v47 = vpop.f32.mrf.mxu0 }
 0x3da   : > { %v1083_v49 = vpop.f32.mrf.mxu2 }
 0x3db   : > { %v1087_v15 = vadd.f32 %v1083_v49, %v1062_v48 }
 0x3dc   : > { %v1107_v50 = vpop.f32.mrf.mxu3 }
 0x3dd   : > { %v1111_v51 = vadd.f32 %v1107_v50, %v1087_v15 }
 0x3de   : > { %v1131_v52 = vpop.f32.mrf.mxu1 }
 0x3df   : > { %v1135_v41 = vadd.f32 %v1131_v52, %v1111_v51 }
 0x3e1   : > { %v1158_v53 = vadd.f32 %v1154_v43, %v1135_v41 }
 0x3e2   : > { %v1085_v54 = vpop.f32.mrf.mxu2 }
 0x3e3   : > { %v1163_v55 = vpack.c.bf16 %v1158_v53, %v1158_v53 }
 0x3e4   : > { %v1109_v56 = vpop.f32.mrf.mxu3 }
 0x3e5   : > { %1915 = vmatmul.msk.bf16.vlgmr.msrb.gmra.mxu2 %vm715_vm0, %v1163_v55 }
 0x3e6   : > { %v1133_v57 = vpop.f32.mrf.mxu1 }
 0x3ec   : > { %v1221_v58 = vpop.f32.mrf.mxu3 }
 0x3ed   : > { %1246 = vrot.lane.b32.xlu0 %v1221_v58, %s2141_s29 }
 0x3f4   : > { %v1223_v60 = vpop.f32.mrf.mxu3 }
 0x45f   : > { %v1247_v17 = vpop.permute.xlu0 %1246 }
 0x468   : > { %v1192_v62 = vpop.f32.mrf.mxu2 }
 0x469   : > { %v1193_v63 = vadd.f32 %v2504_v61, %v1192_v62 }
 0x46b   : > { %v1225_v18 = vadd.f32 %v1221_v58, %v1193_v63 }
 0x46d   : > { %v1925_v0 = vmul.f32 -1.442695, %v1225_v18 }
 0x46f   : > { %2057 = vpow2.f32 %v1925_v0 }
 0x470   : > { %v1194_v1 = vpop.f32.mrf.mxu2 }
 0x475   : > { %v2058_v2 = vpop.eup %2057 }
 0x476   : > { %v1229_v3 = vadd.f32 1.0, %v2058_v2 }
 0x478   : > { %2059 = vrcp.f32 %v1229_v3  ;;  %v1241_v9 = vand.u32 2147483648, %v1229_v3  ;;  %v1239_v12 = vand.u32 2147483647, %v1229_v3  ;;  %vm1235_vm12 = vweird.f32 %v1229_v3 }
 0x47a   : > { %v1242_v19 = vor.u32 1.1754944e-38, %v1241_v9  ;;  %vm1240_vm14 = vcmp.eq.f32.partialorder %v1239_v12, 8.507059e+37 }
 0x47e   : > { %v2060_v5 = vpop.eup %2059 }
 0x47f   : > { %v1231_v6 = vmul.f32 %v2060_v5, %v1229_v3  ;;  %vm1236_vm11 = vweird.f32 %v2060_v5 }
 0x480   : > { %vm1237_vm13 = vmor %vm1235_vm12, %vm1236_vm11 }
 0x481   : > { %v1232_v8 = vsub.f32 1.0, %v1231_v6 }
 0x483   : > { %v1233_v11 = vmul.f32 %v2060_v5, %v1232_v8 }
 0x485   : > { %v1234_v16 = vadd.f32 %v2060_v5, %v1233_v11 }
 0x487   : > { %v1238_v23 = vsel %vm1237_vm13, %v2060_v5, %v1234_v16 }
 0x488   : > { %v1243_v25 = vsel %vm1240_vm14, %v1242_v19, %v1238_v23 }
 0x489   : > { %v1249_v26 = vmul.f32 %v1247_v17, %v1243_v25  ;;  %v1256_v31 = vsub.f32 1.0, %v1243_v25 }
 0x48b   : > { %1251 = vrot.lane.b32.xlu2 %v1249_v26, %s2147_s3  ;;  %v1257_v36 = vmul.f32 %v1256_v31, %v2379_v14 }
 0x4e5   : > { %v1252_v27 = vpop.permute.xlu2 %1251 }
 0x4e6   : > { %v1254_v28 = vadd.f32 %v1252_v27, %v1193_v63 }
 0x4e8   : > { %2061 = vtanh.f32 %v1254_v28 }
 0x4ee   : > { %v2062_v30 = vpop.eup %2061 }
 0x4ef   : > { %1259 = vrot.lane.b32.xlu1 %v2062_v30, %s2146_s23 }
 0x561   : > { %v1260_v32 = vpop.permute.xlu1 %1259 }
 0x562   : > { %v1262_v37 = vmul.f32 %v1260_v32, %v1243_v25 }
 0x564   : > { %v2510_v38 = vadd.f32 %v1262_v37, %v1257_v36 }
 0x566   : > { %v1264_v40 = vpack.c.bf16 %v2510_v38, %v2510_v38 }
 0x568   : > { %1926 = vmatmul.msk.bf16.vlgmr.msrb.gmra.mxu1 %vm715_vm0, %v1264_v40  ;;  %1927 = vmatmul.msk.bf16.vlgmr.msrb.gmra.mxu0 %vm715_vm0, %v1264_v40 }
 0x5e5   : > { %v1277_v42 = vpop.f32.mrf.mxu1  ;;  %v1290_v43 = vpop.f32.mrf.mxu0 }
 0x5e6   : > { %v1278_v47 = vadd.f32 %v1277_v42, %v2424_v59  ;;  %v1291_v48 = vadd.f32 %v1290_v43, %v2440_v7 }
 0x5e8   : > { %v1294_v49 = vpack.c.bf16 %v1278_v47, %v1278_v47  ;;  %v1370_v15 = vpack.c.bf16 %v1291_v48, %v1291_v48 }
 0x5ea   : > { %v1372_v14 = vand.u32 %v1370_v15, %v2341_v44  ;;  %1351 = vrot.lane.b32.xlu1 %v1294_v49, %s2147_s3  ;;  %1332 = vrot.lane.b32.xlu2 %v1294_v49, %s2146_s23  ;;  %v1296_v50 = vand.u32 %v1294_v49, %v2341_v44 }
 0x5eb   : > { %1313 = vrot.lane.b32.xlu0 %v1294_v49, %s2141_s29 }
 0x5ec   : > { %1305 = vmatpush.bf16.msra.mxu2 %v1296_v50 }
 0x5ed   : > { %v1279_v51 = vpop.f32.mrf.mxu1  ;;  %v1292_v52 = vpop.f32.mrf.mxu0 }
 0x5ef   : > { %1928 = vmatmul.msk.bf16.vlgmr.msra.gmra.mxu2 %vm741_vm1, %v2434_v4 }
 0x5f0   : > { %1381 = vmatpush.bf16.msrb.mxu2 %v1372_v14 }
 0x5f4   : > { %1480 = vmatpush.bf16.msra.mxu2 %v2396_v22 }
 0x5f8   : > { %1481 = vmatpush.bf16.msra.mxu2 %v2402_v24 }
 0x5ff   : > { %1932 = vmatmul.msk.bf16.vlgmr.msrb.gmra.mxu2 %vm741_vm1, %v2447_v20 }
 0x644   : > { %v1333_v41 = vpop.permute.xlu2 %1332 }
 0x645   : > { %v1335_v53 = vand.u32 %v1333_v41, %v2341_v44 }
 0x647   : > { %1344 = vmatpush.bf16.msra.mxu1 %v1335_v53 }
 0x64a   : > { %1930 = vmatmul.msk.bf16.vlgmr.msra.gmra.mxu1 %vm741_vm1, %v2466_v34 }
 0x64b   : > { %1411 = vmatpush.bf16.msrb.mxu1 %v2458_v29 }
 0x64f   : > { %1412 = vmatpush.bf16.msrb.mxu1 %v2472_v35 }
 0x65a   : > { %1934 = vmatmul.msk.bf16.vlgmr.msrb.gmra.mxu1 %vm715_vm0, %v1264_v40 }
 0x65c   : > { %v1352_v54 = vpop.permute.xlu1 %1351 }
 0x65d   : > { %v1354_v22 = vand.u32 %v1352_v54, %v2341_v44  ;;  %v1314_v24 = vpop.permute.xlu0 %1313 }
 0x65e   : > { %v1316_v55 = vand.u32 %v1314_v24, %v2341_v44 }
 0x65f   : > { %1363 = vmatpush.bf16.msra.mxu0 %v1354_v22 }
 0x660   : > { %1325 = vmatpush.bf16.msra.mxu3 %v1316_v55 }
 0x662   : > { %1931 = vmatmul.msk.bf16.vlgmr.msra.gmra.mxu0 %vm741_vm1, %v2478_v39 }
 0x663   : > { %1467 = vmatpush.bf16.msrb.mxu0 %v2363_v10  ;;  %1929 = vmatmul.msk.bf16.vlgmr.msra.gmra.mxu3 %vm741_vm1, %v2462_v33 }
 0x664   : > { %1398 = vmatpush.bf16.msrb.mxu3 %v2489_v45 }
 0x667   : > { %1468 = vmatpush.bf16.msrb.mxu0 %v2376_v13 }
 0x668   : > { %1399 = vmatpush.bf16.msrb.mxu3 %v2495_v46 }
 0x672   : > { %v1307_v56 = vpop.f32.mrf.mxu2 }
 0x673   : > { %v1311_v1 = vadd.f32 %v1307_v56, %v2449_v21 }
 0x67a   : > { %v1309_v57 = vpop.f32.mrf.mxu2 }
 0x682   : > { %v1383_v58 = vpop.f32.mrf.mxu2 }
 0x68a   : > { %v1385_v60 = vpop.f32.mrf.mxu2 }
 0x6c7   : > { %v1346_v62 = vpop.f32.mrf.mxu1 }
 0x6cf   : > { %v1348_v63 = vpop.f32.mrf.mxu1 }
 0x6d7   : > { %v1414_v18 = vpop.f32.mrf.mxu1 }
 0x6d8   : > { %1439 = vrot.lane.b32.xlu0 %v1414_v18, %s2141_s29 }
 0x6df   : > { %v1365_v10 = vpop.f32.mrf.mxu0  ;;  %v1416_v0 = vpop.f32.mrf.mxu1 }
 0x6e6   : > { %v1327_v2 = vpop.f32.mrf.mxu3 }
 0x6e7   : > { %v1331_v3 = vadd.f32 %v1327_v2, %v1311_v1  ;;  %v1367_v5 = vpop.f32.mrf.mxu0 }
 0x6e9   : > { %v1350_v6 = vadd.f32 %v1346_v62, %v1331_v3 }
 0x6eb   : > { %v1369_v13 = vadd.f32 %v1365_v10, %v1350_v6 }
 0x6ed   : > { %v1387_v8 = vadd.f32 %v1383_v58, %v1369_v13 }
 0x6ee   : > { %v1329_v9 = vpop.f32.mrf.mxu3 }
 0x6ef   : > { %v1388_v11 = vpack.c.bf16 %v1387_v8, %v1387_v8 }
 0x6f1   : > { %1933 = vmatmul.msk.bf16.vlgmr.msrb.gmra.mxu3 %vm715_vm0, %v1388_v11 }
 0x74a   : > { %v1440_v43 = vpop.permute.xlu0 %1439 }
 0x774   : > { %v1401_v12 = vpop.f32.mrf.mxu3 }
 0x775   : > { %v1402_v16 = vadd.f32 %v2504_v61, %v1401_v12 }
 0x777   : > { %v1418_v17 = vadd.f32 %v1414_v18, %v1402_v16 }
 0x779   : > { %v1935_v19 = vmul.f32 -1.442695, %v1418_v17 }
 0x77b   : > { %2063 = vpow2.f32 %v1935_v19 }
 0x77c   : > { %v1403_v23 = vpop.f32.mrf.mxu3 }
 0x781   : > { %v2064_v25 = vpop.eup %2063 }
 0x782   : > { %v1422_v26 = vadd.f32 1.0, %v2064_v25 }
 0x784   : > { %2065 = vrcp.f32 %v1422_v26  ;;  %v1434_v31 = vand.u32 2147483648, %v1422_v26  ;;  %v1432_v36 = vand.u32 2147483647, %v1422_v26  ;;  %vm1428_vm3 = vweird.f32 %v1422_v26 }
 0x786   : > { %v1435_v40 = vor.u32 1.1754944e-38, %v1434_v31  ;;  %vm1433_vm5 = vcmp.eq.f32.partialorder %v1432_v36, 8.507059e+37 }
 0x78a   : > { %v2066_v27 = vpop.eup %2065 }
 0x78b   : > { %v1424_v28 = vmul.f32 %v2066_v27, %v1422_v26  ;;  %vm1429_vm15 = vweird.f32 %v2066_v27 }
 0x78c   : > { %vm1430_vm4 = vmor %vm1428_vm3, %vm1429_vm15 }
 0x78d   : > { %v1425_v30 = vsub.f32 1.0, %v1424_v28 }
 0x78f   : > { %v1426_v32 = vmul.f32 %v2066_v27, %v1425_v30 }
 0x791   : > { %v1427_v37 = vadd.f32 %v2066_v27, %v1426_v32 }
 0x793   : > { %v1431_v42 = vsel %vm1430_vm4, %v2066_v27, %v1427_v37 }
 0x794   : > { %v1436_v47 = vsel %vm1433_vm5, %v1435_v40, %v1431_v42 }
 0x795   : > { %v1442_v48 = vmul.f32 %v1440_v43, %v1436_v47  ;;  %v1449_v50 = vsub.f32 1.0, %v1436_v47 }
 0x797   : > { %1444 = vrot.lane.b32.xlu2 %v1442_v48, %s2147_s3  ;;  %v1450_v52 = vmul.f32 %v1449_v50, %v2510_v38  ;;  %v1982_v50 = vld [vmem:[%s2666_s17 + $0x8] sm:$0xff] }
 0x7f1   : > { %v1445_v49 = vpop.permute.xlu2 %1444 }
 0x7f2   : > { %v1447_v15 = vadd.f32 %v1445_v49, %v1402_v16 }
 0x7f4   : > { %2067 = vtanh.f32 %v1447_v15 }
 0x7fa   : > { %v2068_v14 = vpop.eup %2067 }
 0x7fb   : > { %1452 = vrot.lane.b32.xlu1 %v2068_v14, %s2146_s23  ;;  %v1984_v14 = vld [vmem:[%s2667_s18 + $0x8] sm:$0xff] }
 0x86d   : > { %v1453_v51 = vpop.permute.xlu1 %1452 }
 0x86e   : > { %v1455_v41 = vmul.f32 %v1453_v51, %v1436_v47  ;;  %v1983_v51 = vld [vmem:[%s2667_s18] sm:$0xff] }
 0x870   : > { %v2552_v53 = vadd.f32 %v1455_v41, %v1450_v52  ;;  %v1677_v52 = vld [vmem:[%s686_s0] sm:$0x1] }
 0x871   : > { %v1682_v41 = vpack.c.bf16 %v1677_v52, %v1677_v52 }
 0x872   : > { %v1457_v54 = vpack.c.bf16 %v2552_v53, %v2552_v53 }
 0x874   : > { %1936 = vmatmul.msk.bf16.vlgmr.msrb.gmra.mxu0 %vm715_vm0, %v1457_v54  ;;  %1937 = vmatmul.msk.bf16.vlgmr.msra.gmra.mxu2 %vm715_vm0, %v1457_v54 }
 0x8f1   : > { %v1470_v22 = vpop.f32.mrf.mxu0 }
 0x8f2   : > { %v1471_v24 = vadd.f32 %v1470_v22, %v2424_v59 }
 0x8f4   : > { %v1487_v55 = vpack.c.bf16 %v1471_v24, %v1471_v24 }
 0x8f6   : > { %1525 = vrot.lane.b32.xlu1 %v1487_v55, %s2146_s23  ;;  %1506 = vrot.lane.b32.xlu2 %v1487_v55, %s2141_s29  ;;  %v1489_v38 = vand.u32 %v1487_v55, %v2341_v44 }
 0x8f7   : > { %1544 = vrot.lane.b32.xlu0 %v1487_v55, %s2147_s3  ;;  %v1483_v56 = vpop.f32.mrf.mxu2 }
 0x8f8   : > { %v1484_v57 = vadd.f32 %v1483_v56, %v2440_v7  ;;  %1498 = vmatpush.bf16.msra.mxu3 %v1489_v38 }
 0x8f9   : > { %v1472_v58 = vpop.f32.mrf.mxu0 }
 0x8fa   : > { %v1563_v60 = vpack.c.bf16 %v1484_v57, %v1484_v57  ;;  %v1650_v58 = vld [vmem:[%s2658_s9] sm:$0x1] }
 0x8fb   : > { %1938 = vmatmul.msk.bf16.vlgmr.msra.gmra.mxu3 %vm741_vm1, %v2434_v4 }
 0x8fc   : > { %v1565_v59 = vand.u32 %v1563_v60, %v2341_v44  ;;  %v1981_v60 = vld [vmem:[%s2666_s17] sm:$0xff] }
 0x8fe   : > { %1574 = vmatpush.bf16.msrb.mxu3 %v1565_v59 }
 0x8ff   : > { %v1485_v62 = vpop.f32.mrf.mxu2 }
 0x902   : > { %1704 = vmatpush.bf16.msra.mxu3 %v1984_v14 }
 0x906   : > { %1705 = vmatpush.bf16.msra.mxu3 %v1983_v51 }
 0x90b   : > { %1942 = vmatmul.msk.bf16.vlgmr.msrb.gmra.mxu3 %vm741_vm1, %v2447_v20 }
 0x91b   : > { %1955 = vmatmul.msk.bf16.vlgmr.msra.gmra.mxu3 %vm715_vm0, %v1682_v41 }
 0x950   : > { %v1507_v63 = vpop.permute.xlu2 %1506 }
 0x951   : > { %v1509_v18 = vand.u32 %v1507_v63, %v2341_v44 }
 0x953   : > { %1518 = vmatpush.bf16.msra.mxu1 %v1509_v18 }
 0x956   : > { %1939 = vmatmul.msk.bf16.vlgmr.msra.gmra.mxu1 %vm741_vm1, %v2462_v33 }
 0x957   : > { %1591 = vmatpush.bf16.msrb.mxu1 %v2489_v45 }
 0x95b   : > { %1592 = vmatpush.bf16.msrb.mxu1 %v2495_v46 }
 0x95f   : > { %1732 = vmatpush.bf16.msra.mxu1 %v1982_v50 }
 0x963   : > { %1733 = vmatpush.bf16.msra.mxu1 %v1981_v60 }
 0x968   : > { %v1526_v7 = vpop.permute.xlu1 %1525 }
 0x969   : > { %v1528_v4 = vand.u32 %v1526_v7, %v2341_v44  ;;  %v1545_v10 = vpop.permute.xlu0 %1544 }
 0x96a   : > { %v1547_v0 = vand.u32 %v1545_v10, %v2341_v44 }
 0x96b   : > { %1537 = vmatpush.bf16.msra.mxu0 %v1528_v4  ;;  %v1739_v4 = vld [vmem:[%s2668_s19] sm:$0x1] }
 0x96c   : > { %1556 = vmatpush.bf16.msrb.mxu2 %v1547_v0 }
 0x96e   : > { %1940 = vmatmul.msk.bf16.vlgmr.msra.gmra.mxu0 %vm741_vm1, %v2466_v34 }
 0x96f   : > { %1604 = vmatpush.bf16.msrb.mxu0 %v2458_v29  ;;  %1941 = vmatmul.msk.bf16.vlgmr.msrb.gmra.mxu2 %vm741_vm1, %v2478_v39 }
 0x973   : > { %1605 = vmatpush.bf16.msrb.mxu0 %v2472_v35 }
 0x97e   : > { %v1500_v20 = vpop.f32.mrf.mxu3  ;;  %1944 = vmatmul.msk.bf16.vlgmr.msrb.gmra.mxu0 %vm715_vm0, %v1457_v54 }
 0x97f   : > { %v1504_v5 = vadd.f32 %v1500_v20, %v2449_v21 }
 0x986   : > { %v1502_v33 = vpop.f32.mrf.mxu3 }
 0x98e   : > { %v1576_v45 = vpop.f32.mrf.mxu3 }
 0x996   : > { %v1578_v46 = vpop.f32.mrf.mxu3 }
 0x9d3   : > { %v1520_v1 = vpop.f32.mrf.mxu1 }
 0x9d4   : > { %v1524_v29 = vadd.f32 %v1520_v1, %v1504_v5 }
 0x9db   : > { %v1522_v2 = vpop.f32.mrf.mxu1 }
 0x9eb   : > { %v1539_v3 = vpop.f32.mrf.mxu0 }
 0x9ec   : > { %v1543_v6 = vadd.f32 %v1539_v3, %v1524_v29 }
 0x9f2   : > { %v1558_v13 = vpop.f32.mrf.mxu2 }
 0x9f3   : > { %v1562_v34 = vadd.f32 %v1558_v13, %v1543_v6  ;;  %v1541_v8 = vpop.f32.mrf.mxu0 }
 0x9f5   : > { %v1580_v9 = vadd.f32 %v1576_v45, %v1562_v34 }
 0x9f7   : > { %v1581_v39 = vpack.c.bf16 %v1580_v9, %v1580_v9 }
 0x9f9   : > { %1943 = vmatmul.msk.bf16.vlgmr.msrb.gmra.mxu1 %vm715_vm0, %v1581_v39 }
 0x9fa   : > { %v1560_v35 = vpop.f32.mrf.mxu2 }
 0x9fb   : > { %v1607_v11 = vpop.f32.mrf.mxu0 }
 0x9fc   : > { %1632 = vrot.lane.b32.xlu0 %v1607_v11, %s2141_s29  ;;  %s2089_s29 = sshra.s32 %s1756_s26, 4  ;;  %s2090_s29 = int_to_ptr.hbm [resolvable:$true] %s2089_s29 }
 0x9fd   : > { %s2091_s30 = scalar_lea.hbm %s2090_s29, 1  ;;  %p2096_p0 = scmp.lt.s32.totalorder %s2090_s29, %s2669_s20 }
 0x9fe   : > { %p2092_p11 = scmp.ne.s32.totalorder %s2090_s29, %s2091_s30  ;;  %p2097_p1 = scmp.lt.s32.totalorder %s2095_s21, %s2091_s30 }
 0xa00   : > { %p2093_p12 = pnand %p2092_p11, %p2291_p5  ;;  %p2098_p2 = por %p2097_p1, %p2096_p0 }
 0xa02   : > { %p2094_p13 = pneg %p2093_p12 }
 0xa03   : > { %v1609_v12 = vpop.f32.mrf.mxu0 }
 0xa04   : > { %p2099_p3 = pnand %p2098_p2, %p2094_p13 }
 0xa6e   : > { %v1633_v42 = vpop.permute.xlu0 %1632 }
 0xa76   : > { %v1594_v16 = vpop.f32.mrf.mxu1 }
 0xa77   : > { %v1595_v17 = vadd.f32 %v2504_v61, %v1594_v16 }
 0xa79   : > { %v1611_v19 = vadd.f32 %v1607_v11, %v1595_v17 }
 0xa7b   : > { %v1945_v23 = vmul.f32 -1.442695, %v1611_v19 }
 0xa7d   : > { %2069 = vpow2.f32 %v1945_v23 }
 0xa7e   : > { %v1596_v21 = vpop.f32.mrf.mxu1 }
 0xa83   : > { %v2070_v25 = vpop.eup %2069 }
 0xa84   : > { %v1615_v26 = vadd.f32 1.0, %v2070_v25 }
 0xa86   : > { %2071 = vrcp.f32 %v1615_v26  ;;  %v1627_v31 = vand.u32 2147483648, %v1615_v26  ;;  %v1625_v36 = vand.u32 2147483647, %v1615_v26  ;;  %vm1621_vm7 = vweird.f32 %v1615_v26 }
 0xa88   : > { %v1628_v40 = vor.u32 1.1754944e-38, %v1627_v31  ;;  %vm1626_vm9 = vcmp.eq.f32.partialorder %v1625_v36, 8.507059e+37 }
 0xa8c   : > { %v2072_v27 = vpop.eup %2071 }
 0xa8d   : > { %v1617_v28 = vmul.f32 %v2072_v27, %v1615_v26  ;;  %vm1622_vm6 = vweird.f32 %v2072_v27 }
 0xa8e   : > { %vm1623_vm8 = vmor %vm1621_vm7, %vm1622_vm6 }
 0xa8f   : > { %v1618_v30 = vsub.f32 1.0, %v1617_v28 }
 0xa91   : > { %v1619_v32 = vmul.f32 %v2072_v27, %v1618_v30 }
 0xa93   : > { %v1620_v37 = vadd.f32 %v2072_v27, %v1619_v32 }
 0xa95   : > { %v1624_v61 = vsel %vm1623_vm8, %v2072_v27, %v1620_v37 }
 0xa96   : > { %v1629_v43 = vsel %vm1626_vm9, %v1628_v40, %v1624_v61 }
 0xa97   : > { %v1635_v47 = vmul.f32 %v1633_v42, %v1629_v43  ;;  %v1642_v54 = vsub.f32 1.0, %v1629_v43 }
 0xa99   : > { %1637 = vrot.lane.b32.xlu2 %v1635_v47, %s2147_s3  ;;  %v1643_v24 = vmul.f32 %v1642_v54, %v2552_v53  ;;  %v1707_v53 = vpop.f32.mrf.mxu3  ;;  %s671_s3 = scalar_lea.vmem [#allocation3], %s670_s7 }
 0xa9a   : > { %s1753_s28 = sshll.u32 %s671_s3, 4  ;;  %s1754_s28 = int_to_ptr.vmem [resolvable:$true] %s1753_s28 }
 0xaa1   : > { %v1709_v59 = vpop.f32.mrf.mxu3 }
 0xaf3   : > { %v1638_v48 = vpop.permute.xlu2 %1637 }
 0xaf4   : > { %v1640_v49 = vadd.f32 %v1638_v48, %v1595_v17 }
 0xaf6   : > { %2073 = vtanh.f32 %v1640_v49 }
 0xafc   : > { %v2074_v15 = vpop.eup %2073 }
 0xafd   : > { %1645 = vrot.lane.b32.xlu1 %v2074_v15, %s2146_s23  ;;  %s1743_s23 = scalar_lea.sflag [#allocation4], %s670_s7 }
 0xb6f   : > { %v1646_v22 = vpop.permute.xlu1 %1645 }
 0xb70   : > { %v1648_v55 = vmul.f32 %v1646_v22, %v1629_v43 }
 0xb72   : > { %v1649_v38 = vadd.f32 %v1648_v55, %v1643_v24 }
 0xb74   : > { %v1651_v56 = vpack.c.bf16 %v1649_v38, %v1649_v38 }
 0xb76   : > { %v1656_v57 = vand.u32 %v1651_v56, %v2341_v44 }
 0xb78   : > { %1665 = vmatpush.bf16.msra.mxu2 %v1656_v57 }
 0xb7b   : > { %1946 = vmatmul.msk.bf16.vlgmr.msra.gmra.mxu2 %vm741_vm1, %v1650_v58 }
 0xbfe   : > { %v1667_v62 = vpop.f32.mrf.mxu2 }
 0xbff   : > { %v1671_v63 = vmul.f32 0.2, %v1667_v62 }
 0xc01   : > { %v1676_v18 = vpack.c.bf16 %v1671_v63, %v1671_v63 }
 0xc03   : > { %1964 = vmatmul.msk.bf16.vlgmr.msra.gmra.mxu1 %vm715_vm0, %v1676_v18 }
 0xc06   : > { %v1669_v44 = vpop.f32.mrf.mxu2 }
 0xc80   : > { %v1735_v7 = vpop.f32.mrf.mxu1 }
 0xc81   : > { %v1736_v10 = vadd.f32 %v1735_v7, %v1707_v53 }
 0xc83   : > { %v1740_v0 = vadd.f32 %v1739_v4, %v1736_v10 }
 0xc85   : > { %1741 = vst.msk [vmem:[%s671_s3] sm:$0x1] %vm751_vm2, %v1740_v0 }
 0xc86   : > { %2102 = shalt.err (!%p2099_p3)
}
 0xc87   : > { %1989 = dma.vmem_to_hbm [thread:$0]  (%p2291_p5), %s1754_s28, 16, %s1756_s26, %s1743_s23  }
 0xc88   : > { %v1737_v20 = vpop.f32.mrf.mxu1 }
 0xc89 PF: > { %p1995_p4 = scmp.ge.s32.totalorder %s2137_s24, 2  ;;  %s1767_s10 = sand.u32 1, %s2125_s1  }
 0xc8a   : > { %s1768_s3 = scalar_lea.sflag [#allocation4], %s1767_s10 }
 0xc8b   : > { %p1992_p7 = pnand %p1995_p4, %p2295_p6 }
 0xc8d   : > { %p1993_p8 = pneg %p1992_p7 }
 0xc8f   : > { %2120 = dma.done.wait (%p1993_p8), %s1768_s3, 16  }
 0xc90   : > { %2122 = vsyncadd (%p1993_p8), %s1768_s3, 4294967280  ;;  %s2695_s24 = sld [smem:[#allocation7_spill]]  ;;  %s2698_s1 = smov %s2129_s22 }
 0xc91   : > { %s2696_s29 = sld [smem:[#allocation6_spill]] }
 0xc92   : > { %s2697_s23 = sld [smem:[#allocation8_spill]] }
 0xc96   : > { %p30_p9 = scmp.ge.s32.totalorder %s2695_s24, 4  }
 0xc97   : > { %s2699_s22 = smov %s2696_s29 }
 0xc98   :  { %32 = sbr.rel (!%p30_p9) target bundleno = 11 (0xb), region = 151 }
 0xc9d   :  { %1773 = vsyncpa [#allocation4], 1 }
 0xc9e   :  { %1775 = vsyncpa [#allocation4 + $0x1], 1 }

</bundles_post_ra>
